<compile_context>
chip_gen: v7x
topology: tpu7x:2x2x1
jax: 0.10.0
libtpu: 0.0.40
codegen_flags: <defaults>
</compile_context>

<pallas_src>
import functools

import jax
import jax.numpy as jnp
from jax.experimental import pallas as pl
from jax.experimental.pallas import tpu as pltpu


def _round_up(x, m):
    return ((x + m - 1) // m) * m


# ----------------------------------------------------------------------------
# Pallas kernel: whole ensemble fused, batch-tiled grid
# ----------------------------------------------------------------------------
def _softplus(x):
    # numerically-stable softplus, elementwise (VPU/EUP friendly)
    return jnp.maximum(x, 0.0) + jnp.log1p(jnp.exp(-jnp.abs(x)))


def _ensemble_kernel(z_ref, xpad_ref, eps_ref, w1_ref, w23_ref, vecs_ref,
                     out_ref, *, E, EH, EH_pad, Dout, Dpad):
    """One batch tile, all E members.

    z_ref    : (TB, Din)             bf16   [obs | action]
    xpad_ref : (TB, Dpad)            f32    [obs | zeros]
    eps_ref  : (TB, E*Dpad)          f32    reparameterization noise
    w1_ref   : (Din, E*H)            bf16   layer-1, ensemble fused on lanes
    w23_ref  : (E*H, EH_pad + E*2*Dpad) bf16  [W2 block-diag | head block-diag]
    vecs_ref : (8, max(EH, E*2*Dpad)) f32   rows: b1, b2, bh, clamp_max, clamp_min
    out_ref  : (TB, E*Dpad)          f32    per member: [next_obs|reward|var|0..]
    """
    Dh = 2 * Dpad

    z = z_ref[...]                                   # (TB, Din) bf16
    b1 = vecs_ref[0:1, 0:EH]                         # (1, EH) f32
    b2 = vecs_ref[1:2, 0:EH]
    bh = vecs_ref[2:3, 0:E * Dh]

    # --- encoder layer 1 (all members in one matmul) ---
    h = jnp.dot(z, w1_ref[...], preferred_element_type=jnp.float32) + b1
    h = jnp.maximum(h, 0.0)                          # (TB, EH) f32

    # --- encoder layer 2 (block-diagonal over members) ---
    h = jnp.dot(h.astype(jnp.bfloat16), w23_ref[:, 0:EH],
                preferred_element_type=jnp.float32) + b2
    h = jnp.maximum(h, 0.0)                          # (TB, EH) f32

    # --- fused mu|logstd head (block-diagonal over members) ---
    ms = jnp.dot(h.astype(jnp.bfloat16), w23_ref[:, EH_pad:EH_pad + E * Dh],
                 preferred_element_type=jnp.float32) + bh   # (TB, E*Dh) f32

    xpad = xpad_ref[...]                             # (TB, Dpad) f32
    lane = jax.lax.broadcasted_iota(jnp.int32, xpad.shape, 1)
    is_var_lane = lane == Dout                       # hoisted out of the loop

    for e in range(E):                               # static unroll, tiny E
        mu = ms[:, e * Dh: e * Dh + Dpad]            # tile-aligned views
        logstd = ms[:, e * Dh + Dpad: (e + 1) * Dh]

        # soft clamp (compute_stats); clamp rows broadcast once per member
        cmax = jnp.broadcast_to(vecs_ref[3:4, e * Dpad:(e + 1) * Dpad],
                                logstd.shape)
        cmin = jnp.broadcast_to(vecs_ref[4:5, e * Dpad:(e + 1) * Dpad],
                                logstd.shape)
        logstd = cmax - _softplus(cmax - logstd)
        logstd = cmin + _softplus(logstd - cmin)

        # reparameterized sample: pred = mu + std * eps   (pad lanes: std == 0)
        std = jnp.exp(logstd)
        pred = mu + std * eps_ref[:, e * Dpad:(e + 1) * Dpad]

        # per-model predictive variance (pad lanes contribute exactly 0)
        var = jnp.sum(std * std, axis=1, keepdims=True)          # (TB, 1)

        # member slab: [x + pred_obs | pred_reward | var | 0...], one 128-wide
        # unmasked tile-aligned store per member
        slab = jnp.where(is_var_lane, var, xpad + pred)
        out_ref[:, e * Dpad:(e + 1) * Dpad] = slab


# ----------------------------------------------------------------------------
# Wrapper
# ----------------------------------------------------------------------------
def ensemble_predict_with_variance(x, action, packed_params, eps, indices=None,
                                   variance_type="data", batch_tile=512):
    """Mirror of ProbabilisticEnsembleDynamicsModel.predict_with_variance.

    eps: (B, E, obs_dim + 1) reparameterization noise, one draw per model.
    """
    B, obs_dim = x.shape
    E = eps.shape[1]
    Dout = obs_dim + 1
    Dpad = 128
    Dh = 2 * Dpad

    w1 = packed_params["w1"]           # (Din, E*H) bf16
    w23 = packed_params["w23"]         # (E*H, EH_pad + E*Dh) bf16
    vecs = packed_params["vecs"]       # (8, max(EH, E*Dh)) f32
    Din, EH = w1.shape
    EH_pad = _round_up(EH, 128)

    x32 = x.astype(jnp.float32)
    z = jnp.concatenate([x32, action.astype(jnp.float32)],
                        axis=1).astype(jnp.bfloat16)                  # (B, Din)
    xpad = jnp.pad(x32, ((0, 0), (0, Dpad - obs_dim)))                # (B, Dpad)
    eps_p = jnp.pad(eps.astype(jnp.float32),
                    ((0, 0), (0, 0), (0, Dpad - Dout))).reshape(B, E * Dpad)

    # --- batch tiling (parallel grid axis: uses both TCs on v7x) ---
    TB = _round_up(min(batch_tile, _round_up(B, 8)), 8)
    Bp = _round_up(B, TB)
    if Bp != B:
        pad = Bp - B
        z = jnp.pad(z, ((0, pad), (0, 0)))
        xpad = jnp.pad(xpad, ((0, pad), (0, 0)))
        eps_p = jnp.pad(eps_p, ((0, pad), (0, 0)))
    grid = (Bp // TB,)

    # explicit VMEM budget: 2x double-buffering of every tiled stream + weights
    act_bytes = TB * (Din * 2 + Dpad * 4 + E * Dpad * 4 + E * Dpad * 4)
    w_bytes = (w1.size + w23.size) * 2 + vecs.size * 4
    vmem_limit = int(min(64 * 1024 * 1024,
                         max(8 * 1024 * 1024,
                             2 * (act_bytes + w_bytes) + (4 << 20))))

    grid_spec = pltpu.PrefetchScalarGridSpec(
        num_scalar_prefetch=0,
        grid=grid,
        in_specs=[
            pl.BlockSpec((TB, Din), lambda i: (i, 0)),          # z
            pl.BlockSpec((TB, Dpad), lambda i: (i, 0)),         # xpad
            pl.BlockSpec((TB, E * Dpad), lambda i: (i, 0)),     # eps
            pl.BlockSpec(w1.shape, lambda i: (0, 0)),           # weights stay
            pl.BlockSpec(w23.shape, lambda i: (0, 0)),          # VMEM-resident
            pl.BlockSpec(vecs.shape, lambda i: (0, 0)),
        ],
        out_specs=pl.BlockSpec((TB, E * Dpad), lambda i: (i, 0)),
    )

    packed = pl.pallas_call(
        functools.partial(_ensemble_kernel, E=E, EH=EH, EH_pad=EH_pad,
                          Dout=Dout, Dpad=Dpad),
        out_shape=jax.ShapeDtypeStruct((Bp, E * Dpad), jnp.float32),
        grid_spec=grid_spec,
        compiler_params=pltpu.CompilerParams(
            dimension_semantics=("parallel",),
            vmem_limit_bytes=vmem_limit),
    )(z, xpad, eps_p, w1, w23, vecs)

    # free row-major reshape; strip batch + lane padding in glue
    packed = packed[:B].reshape(B, E, Dpad)
    observations = packed[:, :, :obs_dim]             # (B, E, obs_dim)
    rewards = packed[:, :, obs_dim:Dout]              # (B, E, 1)
    per_model_variances = packed[:, :, Dout:Dout + 1]  # (B, E, 1)

    # _compute_ensemble_variance (glue-level reduction over tiny E axis)
    if variance_type == "max":
        variances = jnp.max(per_model_variances, axis=1)
    elif variance_type == "data":
        data = packed[:, :, :Dout]                    # [next_obs | reward]
        # torch.std uses the unbiased estimator (ddof=1)
        variances = jnp.sum(jnp.var(data, axis=1, ddof=1), axis=1,
                            keepdims=True)
    else:
        raise ValueError(f"invalid variance_type: {variance_type}")

    if indices is None:
        return observations, rewards, variances

    batch_idx = jnp.arange(B)
    partial_observations = observations[batch_idx, indices]
    partial_rewards = rewards[batch_idx, indices]
    return partial_observations, partial_rewards, variances


def ensemble_forward(x, action, packed_params, eps, indices=None,
                     batch_tile=512):
    """Mirror of ProbabilisticEnsembleDynamicsModel.forward."""
    return ensemble_predict_with_variance(x, action, packed_params, eps,
                                          indices=indices,
                                          batch_tile=batch_tile)[:2]


# ----------------------------------------------------------------------------
# Deterministic parameter construction (synthetic weights)
# ----------------------------------------------------------------------------
def _spectral_normalize(w, key, n_iter=30):
    """Divide weight by its largest singular value (power iteration).

    # TODO(synk): torch spectral_norm keeps a persistent power-iteration
    # buffer updated every training-mode forward; here sigma is estimated
    # once at parameter-construction time (eval-mode equivalent).
    """
    u = jax.random.normal(key, (w.shape[1],), dtype=jnp.float32)
    u = u / (jnp.linalg.norm(u) + 1e-12)
    v = jnp.zeros((w.shape[0],), dtype=jnp.float32)
    for _ in range(n_iter):
        v = w @ u
        v = v / (jnp.linalg.norm(v) + 1e-12)
        u = w.T @ v
        u = u / (jnp.linalg.norm(u) + 1e-12)
    sigma = v @ (w @ u)
    return w / sigma


def make_ensemble_params(key, n_models, obs_dim, act_dim, hidden):
    """Raw per-member parameters matching the torch module layout."""
    Din = obs_dim + act_dim
    Dout = obs_dim + 1
    keys = jax.random.split(key, n_models * 7).reshape(n_models, 7, 2)

    w1, b1, w2, b2, wmu, bmu, wls, bls = [], [], [], [], [], [], [], []
    for m in range(n_models):
        k = keys[m]
        # encoder fc1 / fc2 and mu head get spectral norm (as in __init__);
        # logstd head does not.
        _w1 = 0.1 * jax.random.normal(k[0], (Din, hidden), jnp.float32)
        _w2 = 0.1 * jax.random.normal(k[1], (hidden, hidden), jnp.float32)
        _wmu = 0.1 * jax.random.normal(k[2], (hidden, Dout), jnp.float32)
        _wls = 0.1 * jax.random.normal(k[3], (hidden, Dout), jnp.float32)
        _w1 = _spectral_normalize(_w1, k[4])
        _w2 = _spectral_normalize(_w2, k[5])
        _wmu = _spectral_normalize(_wmu, k[6])
        w1.append(_w1); w2.append(_w2); wmu.append(_wmu); wls.append(_wls)
        b1.append(0.01 * jnp.ones((1, hidden), jnp.float32))
        b2.append(0.01 * jnp.ones((1, hidden), jnp.float32))
        bmu.append(jnp.zeros((1, Dout), jnp.float32))
        bls.append(jnp.zeros((1, Dout), jnp.float32))

    return {
        "w1": jnp.stack(w1), "b1": jnp.stack(b1),
        "w2": jnp.stack(w2), "b2": jnp.stack(b2),
        "wmu": jnp.stack(wmu), "bmu": jnp.stack(bmu),
        "wls": jnp.stack(wls), "bls": jnp.stack(bls),
        # init_max = 2.0, init_min = -10.0 (per module __init__)
        "max_logstd": jnp.full((n_models, 1, Dout), 2.0, jnp.float32),
        "min_logstd": jnp.full((n_models, 1, Dout), -10.0, jnp.float32),
    }


def pack_ensemble_params(p, obs_dim):
    """Fuse the ensemble into 3 kernel buffers (done once, outside hot path).

    Returns:
      w1   (Din, E*H)                 bf16  layer-1 weights, members on lanes
      w23  (E*H, EH_pad + E*2*128)    bf16  [W2 block-diag (lane-padded) | head]
      vecs (8, max(E*H, E*2*128))     f32   b1 / b2 / bh / clamp_max / clamp_min
    """
    E, Din, H = p["w1"].shape
    Dout = obs_dim + 1
    Dpad = 128
    Dh = 2 * Dpad
    EH = E * H
    EH_pad = _round_up(EH, 128)
    padw = Dpad - Dout

    # layer-1: ensemble fused along output lanes
    w1cat = jnp.concatenate([p["w1"][e] for e in range(E)], axis=1)   # (Din, EH)
    b1cat = jnp.concatenate([p["b1"][e] for e in range(E)], axis=1)   # (1, EH)

    # layer-2: block-diagonal over members
    w2bd = jax.scipy.linalg.block_diag(*[p["w2"][e] for e in range(E)])
    b2cat = jnp.concatenate([p["b2"][e] for e in range(E)], axis=1)

    # head: per member [mu | logstd], each lane-padded Dout -> 128, block-diag
    heads, bhs, cmaxs, cmins = [], [], [], []
    for e in range(E):
        wmu = jnp.pad(p["wmu"][e], ((0, 0), (0, padw)))
        wls = jnp.pad(p["wls"][e], ((0, 0), (0, padw)))
        heads.append(jnp.concatenate([wmu, wls], axis=1))             # (H, Dh)
        bmu = jnp.pad(p["bmu"][e], ((0, 0), (0, padw)))
        bls = jnp.pad(p["bls"][e], ((0, 0), (0, padw)))
        bhs.append(jnp.concatenate([bmu, bls], axis=1))               # (1, Dh)
        # clamp pad lanes = -1e4 so exp(logstd) underflows to exactly 0 there
        cmaxs.append(jnp.pad(p["max_logstd"][e], ((0, 0), (0, padw)),
                             constant_values=-1e4))
        cmins.append(jnp.pad(p["min_logstd"][e], ((0, 0), (0, padw)),
                             constant_values=-1e4))
    whbd = jax.scipy.linalg.block_diag(*heads)                        # (EH, E*Dh)
    bhcat = jnp.concatenate(bhs, axis=1)                              # (1, E*Dh)
    cmax = jnp.concatenate(cmaxs, axis=1)                             # (1, E*Dpad)
    cmin = jnp.concatenate(cmins, axis=1)

    w23 = jnp.concatenate(
        [jnp.pad(w2bd, ((0, 0), (0, EH_pad - EH))), whbd], axis=1)

    wvec = max(EH, E * Dh)
    vecs = jnp.zeros((8, wvec), jnp.float32)
    vecs = vecs.at[0, :EH].set(b1cat[0])
    vecs = vecs.at[1, :EH].set(b2cat[0])
    vecs = vecs.at[2, :E * Dh].set(bhcat[0])
    vecs = vecs.at[3, :E * Dpad].set(cmax[0])
    vecs = vecs.at[4, :E * Dpad].set(cmin[0])

    return {
        "w1": w1cat.astype(jnp.bfloat16),
        "w23": w23.astype(jnp.bfloat16),
        "vecs": vecs,
    }


# ----------------------------------------------------------------------------
# Main
# ----------------------------------------------------------------------------
if __name__ == "__main__":
    key = jax.random.PRNGKey(0)
    B, obs_dim, act_dim, hidden, n_models = 64, 16, 4, 32, 3
    Dout = obs_dim + 1

    k_x, k_a, k_p, k_eps, k_idx = jax.random.split(key, 5)
    x = jax.random.normal(k_x, (B, obs_dim), jnp.float32)
    action = jax.random.normal(k_a, (B, act_dim), jnp.float32)
    raw_params = make_ensemble_params(k_p, n_models, obs_dim, act_dim, hidden)
    params = pack_ensemble_params(raw_params, obs_dim)
    # reparameterization noise for Normal.rsample(), one draw per model
    eps = jax.random.normal(k_eps, (B, n_models, Dout), jnp.float32)

    # small batch tile so the demo exercises a multi-step parallel grid
    fwd = jax.jit(functools.partial(ensemble_forward, batch_tile=32))
    observations, rewards = fwd(x, action, params, eps)
    jax.block_until_ready((observations, rewards))

    assert observations.shape == (B, n_models, obs_dim)
    assert rewards.shape == (B, n_models, 1)
    assert bool(jnp.all(jnp.isfinite(observations)))
    assert bool(jnp.all(jnp.isfinite(rewards)))

    # also exercise the indices path + ensemble 'data' variance
    indices = jax.random.randint(k_idx, (B,), 0, n_models)
    p_obs, p_rew, ens_var = ensemble_predict_with_variance(
        x, action, params, eps, indices=indices, batch_tile=32)
    jax.block_until_ready((p_obs, p_rew, ens_var))
    assert p_obs.shape == (B, obs_dim)
    assert p_rew.shape == (B, 1)
    assert ens_var.shape == (B, 1)

    print("KERNEL_OK")
</pallas_src>

<mosaic_0001>
module attributes {stable_mosaic.version = 11 : i64} {
  func.func @_ensemble_kernel(%arg0: i32, %arg1: memref<32x20xbf16, #tpu.memory_space<vmem>>, %arg2: memref<32x128xf32, #tpu.memory_space<vmem>>, %arg3: memref<32x384xf32, #tpu.memory_space<vmem>>, %arg4: memref<20x96xbf16, #tpu.memory_space<vmem>>, %arg5: memref<96x896xbf16, #tpu.memory_space<vmem>>, %arg6: memref<8x768xf32, #tpu.memory_space<vmem>>, %arg7: memref<32x384xf32, #tpu.memory_space<vmem>>) attributes {dimension_semantics = [#tpu.dimension_semantics<parallel>], iteration_bounds = array<i64: 2>, scalar_prefetch = 0 : i64, scratch_operands = 0 : i64, tpu.core_type = #tpu.core_type<tc>, window_params = [{transform_indices = @transform_0, window_bounds = array<i64: 32, 20>}, {transform_indices = @transform_1, window_bounds = array<i64: 32, 128>}, {transform_indices = @transform_2, window_bounds = array<i64: 32, 384>}, {pipeline_mode = #tpu.pipeline_mode<synchronous>, transform_indices = @transform_3, window_bounds = array<i64: 20, 96>}, {pipeline_mode = #tpu.pipeline_mode<synchronous>, transform_indices = @transform_4, window_bounds = array<i64: 96, 896>}, {pipeline_mode = #tpu.pipeline_mode<synchronous>, transform_indices = @transform_5, window_bounds = array<i64: 8, 768>}, {transform_indices = @transform_6, window_bounds = array<i64: 32, 384>}]} {
    %c0 = arith.constant 0 : index
    %c0_0 = arith.constant 0 : index
    %0 = vector.load %arg1[%c0, %c0_0] : memref<32x20xbf16, #tpu.memory_space<vmem>>, vector<32x20xbf16>
    %c0_1 = arith.constant 0 : index
    %c0_2 = arith.constant 0 : index
    %1 = vector.load %arg6[%c0_1, %c0_2] : memref<8x768xf32, #tpu.memory_space<vmem>>, vector<1x96xf32>
    %c1 = arith.constant 1 : index
    %c0_3 = arith.constant 0 : index
    %2 = vector.load %arg6[%c1, %c0_3] : memref<8x768xf32, #tpu.memory_space<vmem>>, vector<1x96xf32>
    %c2 = arith.constant 2 : index
    %c0_4 = arith.constant 0 : index
    %3 = vector.load %arg6[%c2, %c0_4] : memref<8x768xf32, #tpu.memory_space<vmem>>, vector<1x768xf32>
    %c0_5 = arith.constant 0 : index
    %c0_6 = arith.constant 0 : index
    %4 = vector.load %arg4[%c0_5, %c0_6] : memref<20x96xbf16, #tpu.memory_space<vmem>>, vector<20x96xbf16>
    %cst = arith.constant dense<0.000000e+00> : vector<32x96xf32>
    %5 = tpu.matmul %0, %4, %cst {dimension_numbers = #tpu.dot_dimension_numbers<[1], [0], [0], [1], [0, 0, 1, 1], [], []>} : vector<32x20xbf16>, vector<20x96xbf16>, vector<32x96xf32> -> vector<32x96xf32>
    %6 = vector.broadcast %1 : vector<1x96xf32> to vector<32x96xf32>
    %7 = arith.addf %5, %6 : vector<32x96xf32>
    %cst_7 = arith.constant 0.000000e+00 : f32
    %8 = vector.broadcast %cst_7 : f32 to vector<32x96xf32>
    %9 = arith.maximumf %7, %8 : vector<32x96xf32>
    %10 = arith.truncf %9 : vector<32x96xf32> to vector<32x96xbf16>
    %c0_8 = arith.constant 0 : index
    %c0_9 = arith.constant 0 : index
    %11 = vector.load %arg5[%c0_8, %c0_9] : memref<96x896xbf16, #tpu.memory_space<vmem>>, vector<96x96xbf16>
    %cst_10 = arith.constant dense<0.000000e+00> : vector<32x96xf32>
    %12 = tpu.matmul %10, %11, %cst_10 {dimension_numbers = #tpu.dot_dimension_numbers<[1], [0], [0], [1], [0, 0, 1, 1], [], []>} : vector<32x96xbf16>, vector<96x96xbf16>, vector<32x96xf32> -> vector<32x96xf32>
    %13 = vector.broadcast %2 : vector<1x96xf32> to vector<32x96xf32>
    %14 = arith.addf %12, %13 : vector<32x96xf32>
    %cst_11 = arith.constant 0.000000e+00 : f32
    %15 = vector.broadcast %cst_11 : f32 to vector<32x96xf32>
    %16 = arith.maximumf %14, %15 : vector<32x96xf32>
    %17 = arith.truncf %16 : vector<32x96xf32> to vector<32x96xbf16>
    %c0_12 = arith.constant 0 : index
    %c128 = arith.constant 128 : index
    %18 = vector.load %arg5[%c0_12, %c128] : memref<96x896xbf16, #tpu.memory_space<vmem>>, vector<96x768xbf16>
    %cst_13 = arith.constant dense<0.000000e+00> : vector<32x768xf32>
    %19 = tpu.matmul %17, %18, %cst_13 {dimension_numbers = #tpu.dot_dimension_numbers<[1], [0], [0], [1], [0, 0, 1, 1], [], []>} : vector<32x96xbf16>, vector<96x768xbf16>, vector<32x768xf32> -> vector<32x768xf32>
    %20 = vector.broadcast %3 : vector<1x768xf32> to vector<32x768xf32>
    %21 = arith.addf %19, %20 : vector<32x768xf32>
    %c0_14 = arith.constant 0 : index
    %c0_15 = arith.constant 0 : index
    %22 = vector.load %arg2[%c0_14, %c0_15] : memref<32x128xf32, #tpu.memory_space<vmem>>, vector<32x128xf32>
    %23 = tpu.iota {dimensions = array<i32: 1>} : vector<32x128xi32>
    %c17_i32 = arith.constant 17 : i32
    %24 = vector.broadcast %c17_i32 : i32 to vector<32x128xi32>
    %25 = arith.cmpi eq, %23, %24 : vector<32x128xi32>
    %26 = vector.extract_strided_slice %21 {offsets = [0, 0], sizes = [32, 128], strides = [1, 1]} : vector<32x768xf32> to vector<32x128xf32>
    %27 = vector.extract_strided_slice %21 {offsets = [0, 128], sizes = [32, 128], strides = [1, 1]} : vector<32x768xf32> to vector<32x128xf32>
    %c3 = arith.constant 3 : index
    %c0_16 = arith.constant 0 : index
    %28 = vector.load %arg6[%c3, %c0_16] : memref<8x768xf32, #tpu.memory_space<vmem>>, vector<1x128xf32>
    %29 = vector.shape_cast %28 : vector<1x128xf32> to vector<1x128xf32>
    %30 = vector.broadcast %29 : vector<1x128xf32> to vector<32x128xf32>
    %c4 = arith.constant 4 : index
    %c0_17 = arith.constant 0 : index
    %31 = vector.load %arg6[%c4, %c0_17] : memref<8x768xf32, #tpu.memory_space<vmem>>, vector<1x128xf32>
    %32 = vector.shape_cast %31 : vector<1x128xf32> to vector<1x128xf32>
    %33 = vector.broadcast %32 : vector<1x128xf32> to vector<32x128xf32>
    %34 = arith.subf %30, %27 : vector<32x128xf32>
    %cst_18 = arith.constant 0.000000e+00 : f32
    %35 = vector.broadcast %cst_18 : f32 to vector<32x128xf32>
    %36 = arith.maximumf %34, %35 : vector<32x128xf32>
    %37 = math.absf %34 : vector<32x128xf32>
    %cst_19 = arith.constant 0.000000e+00 : f32
    %38 = vector.broadcast %cst_19 : f32 to vector<32x128xf32>
    %39 = arith.subf %38, %37 : vector<32x128xf32>
    %40 = math.exp %39 : vector<32x128xf32>
    %41 = math.log1p %40 : vector<32x128xf32>
    %42 = arith.addf %36, %41 : vector<32x128xf32>
    %43 = arith.subf %30, %42 : vector<32x128xf32>
    %44 = arith.subf %43, %33 : vector<32x128xf32>
    %cst_20 = arith.constant 0.000000e+00 : f32
    %45 = vector.broadcast %cst_20 : f32 to vector<32x128xf32>
    %46 = arith.maximumf %44, %45 : vector<32x128xf32>
    %47 = math.absf %44 : vector<32x128xf32>
    %cst_21 = arith.constant 0.000000e+00 : f32
    %48 = vector.broadcast %cst_21 : f32 to vector<32x128xf32>
    %49 = arith.subf %48, %47 : vector<32x128xf32>
    %50 = math.exp %49 : vector<32x128xf32>
    %51 = math.log1p %50 : vector<32x128xf32>
    %52 = arith.addf %46, %51 : vector<32x128xf32>
    %53 = arith.addf %33, %52 : vector<32x128xf32>
    %54 = math.exp %53 : vector<32x128xf32>
    %c0_22 = arith.constant 0 : index
    %c0_23 = arith.constant 0 : index
    %55 = vector.load %arg3[%c0_22, %c0_23] : memref<32x384xf32, #tpu.memory_space<vmem>>, vector<32x128xf32>
    %56 = arith.mulf %54, %55 : vector<32x128xf32>
    %57 = arith.addf %26, %56 : vector<32x128xf32>
    %58 = arith.mulf %54, %54 : vector<32x128xf32>
    %cst_24 = arith.constant dense<0.000000e+00> : vector<32xf32>
    %59 = vector.multi_reduction <add>, %58, %cst_24 [1] : vector<32x128xf32> to vector<32xf32>
    %60 = vector.shape_cast %59 : vector<32xf32> to vector<32x1xf32>
    %61 = arith.addf %22, %57 : vector<32x128xf32>
    %62 = vector.shape_cast %60 : vector<32x1xf32> to vector<32x1xf32>
    %63 = vector.broadcast %62 : vector<32x1xf32> to vector<32x128xf32>
    %64 = arith.select %25, %63, %61 : vector<32x128xi1>, vector<32x128xf32>
    %c0_25 = arith.constant 0 : index
    %c0_26 = arith.constant 0 : index
    %65 = vector.load %arg7[%c0_25, %c0_26] : memref<32x384xf32, #tpu.memory_space<vmem>>, vector<32x128xf32>
    tpu.vector_store %arg7[%c0_25, %c0_26], %64 {strides = array<i32>} : memref<32x384xf32, #tpu.memory_space<vmem>>, vector<32x128xf32>,
    %66 = vector.extract_strided_slice %21 {offsets = [0, 256], sizes = [32, 128], strides = [1, 1]} : vector<32x768xf32> to vector<32x128xf32>
    %67 = vector.extract_strided_slice %21 {offsets = [0, 384], sizes = [32, 128], strides = [1, 1]} : vector<32x768xf32> to vector<32x128xf32>
    %c3_27 = arith.constant 3 : index
    %c128_28 = arith.constant 128 : index
    %68 = vector.load %arg6[%c3_27, %c128_28] : memref<8x768xf32, #tpu.memory_space<vmem>>, vector<1x128xf32>
    %69 = vector.shape_cast %68 : vector<1x128xf32> to vector<1x128xf32>
    %70 = vector.broadcast %69 : vector<1x128xf32> to vector<32x128xf32>
    %c4_29 = arith.constant 4 : index
    %c128_30 = arith.constant 128 : index
    %71 = vector.load %arg6[%c4_29, %c128_30] : memref<8x768xf32, #tpu.memory_space<vmem>>, vector<1x128xf32>
    %72 = vector.shape_cast %71 : vector<1x128xf32> to vector<1x128xf32>
    %73 = vector.broadcast %72 : vector<1x128xf32> to vector<32x128xf32>
    %74 = arith.subf %70, %67 : vector<32x128xf32>
    %cst_31 = arith.constant 0.000000e+00 : f32
    %75 = vector.broadcast %cst_31 : f32 to vector<32x128xf32>
    %76 = arith.maximumf %74, %75 : vector<32x128xf32>
    %77 = math.absf %74 : vector<32x128xf32>
    %cst_32 = arith.constant 0.000000e+00 : f32
    %78 = vector.broadcast %cst_32 : f32 to vector<32x128xf32>
    %79 = arith.subf %78, %77 : vector<32x128xf32>
    %80 = math.exp %79 : vector<32x128xf32>
    %81 = math.log1p %80 : vector<32x128xf32>
    %82 = arith.addf %76, %81 : vector<32x128xf32>
    %83 = arith.subf %70, %82 : vector<32x128xf32>
    %84 = arith.subf %83, %73 : vector<32x128xf32>
    %cst_33 = arith.constant 0.000000e+00 : f32
    %85 = vector.broadcast %cst_33 : f32 to vector<32x128xf32>
    %86 = arith.maximumf %84, %85 : vector<32x128xf32>
    %87 = math.absf %84 : vector<32x128xf32>
    %cst_34 = arith.constant 0.000000e+00 : f32
    %88 = vector.broadcast %cst_34 : f32 to vector<32x128xf32>
    %89 = arith.subf %88, %87 : vector<32x128xf32>
    %90 = math.exp %89 : vector<32x128xf32>
    %91 = math.log1p %90 : vector<32x128xf32>
    %92 = arith.addf %86, %91 : vector<32x128xf32>
    %93 = arith.addf %73, %92 : vector<32x128xf32>
    %94 = math.exp %93 : vector<32x128xf32>
    %c0_35 = arith.constant 0 : index
    %c128_36 = arith.constant 128 : index
    %95 = vector.load %arg3[%c0_35, %c128_36] : memref<32x384xf32, #tpu.memory_space<vmem>>, vector<32x128xf32>
    %96 = arith.mulf %94, %95 : vector<32x128xf32>
    %97 = arith.addf %66, %96 : vector<32x128xf32>
    %98 = arith.mulf %94, %94 : vector<32x128xf32>
    %cst_37 = arith.constant dense<0.000000e+00> : vector<32xf32>
    %99 = vector.multi_reduction <add>, %98, %cst_37 [1] : vector<32x128xf32> to vector<32xf32>
    %100 = vector.shape_cast %99 : vector<32xf32> to vector<32x1xf32>
    %101 = arith.addf %22, %97 : vector<32x128xf32>
    %102 = vector.shape_cast %100 : vector<32x1xf32> to vector<32x1xf32>
    %103 = vector.broadcast %102 : vector<32x1xf32> to vector<32x128xf32>
    %104 = arith.select %25, %103, %101 : vector<32x128xi1>, vector<32x128xf32>
    %c0_38 = arith.constant 0 : index
    %c128_39 = arith.constant 128 : index
    %105 = vector.load %arg7[%c0_38, %c128_39] : memref<32x384xf32, #tpu.memory_space<vmem>>, vector<32x128xf32>
    tpu.vector_store %arg7[%c0_38, %c128_39], %104 {strides = array<i32>} : memref<32x384xf32, #tpu.memory_space<vmem>>, vector<32x128xf32>,
    %106 = vector.extract_strided_slice %21 {offsets = [0, 512], sizes = [32, 128], strides = [1, 1]} : vector<32x768xf32> to vector<32x128xf32>
    %107 = vector.extract_strided_slice %21 {offsets = [0, 640], sizes = [32, 128], strides = [1, 1]} : vector<32x768xf32> to vector<32x128xf32>
    %c3_40 = arith.constant 3 : index
    %c256 = arith.constant 256 : index
    %108 = vector.load %arg6[%c3_40, %c256] : memref<8x768xf32, #tpu.memory_space<vmem>>, vector<1x128xf32>
    %109 = vector.shape_cast %108 : vector<1x128xf32> to vector<1x128xf32>
    %110 = vector.broadcast %109 : vector<1x128xf32> to vector<32x128xf32>
    %c4_41 = arith.constant 4 : index
    %c256_42 = arith.constant 256 : index
    %111 = vector.load %arg6[%c4_41, %c256_42] : memref<8x768xf32, #tpu.memory_space<vmem>>, vector<1x128xf32>
    %112 = vector.shape_cast %111 : vector<1x128xf32> to vector<1x128xf32>
    %113 = vector.broadcast %112 : vector<1x128xf32> to vector<32x128xf32>
    %114 = arith.subf %110, %107 : vector<32x128xf32>
    %cst_43 = arith.constant 0.000000e+00 : f32
    %115 = vector.broadcast %cst_43 : f32 to vector<32x128xf32>
    %116 = arith.maximumf %114, %115 : vector<32x128xf32>
    %117 = math.absf %114 : vector<32x128xf32>
    %cst_44 = arith.constant 0.000000e+00 : f32
    %118 = vector.broadcast %cst_44 : f32 to vector<32x128xf32>
    %119 = arith.subf %118, %117 : vector<32x128xf32>
    %120 = math.exp %119 : vector<32x128xf32>
    %121 = math.log1p %120 : vector<32x128xf32>
    %122 = arith.addf %116, %121 : vector<32x128xf32>
    %123 = arith.subf %110, %122 : vector<32x128xf32>
    %124 = arith.subf %123, %113 : vector<32x128xf32>
    %cst_45 = arith.constant 0.000000e+00 : f32
    %125 = vector.broadcast %cst_45 : f32 to vector<32x128xf32>
    %126 = arith.maximumf %124, %125 : vector<32x128xf32>
    %127 = math.absf %124 : vector<32x128xf32>
    %cst_46 = arith.constant 0.000000e+00 : f32
    %128 = vector.broadcast %cst_46 : f32 to vector<32x128xf32>
    %129 = arith.subf %128, %127 : vector<32x128xf32>
    %130 = math.exp %129 : vector<32x128xf32>
    %131 = math.log1p %130 : vector<32x128xf32>
    %132 = arith.addf %126, %131 : vector<32x128xf32>
    %133 = arith.addf %113, %132 : vector<32x128xf32>
    %134 = math.exp %133 : vector<32x128xf32>
    %c0_47 = arith.constant 0 : index
    %c256_48 = arith.constant 256 : index
    %135 = vector.load %arg3[%c0_47, %c256_48] : memref<32x384xf32, #tpu.memory_space<vmem>>, vector<32x128xf32>
    %136 = arith.mulf %134, %135 : vector<32x128xf32>
    %137 = arith.addf %106, %136 : vector<32x128xf32>
    %138 = arith.mulf %134, %134 : vector<32x128xf32>
    %cst_49 = arith.constant dense<0.000000e+00> : vector<32xf32>
    %139 = vector.multi_reduction <add>, %138, %cst_49 [1] : vector<32x128xf32> to vector<32xf32>
    %140 = vector.shape_cast %139 : vector<32xf32> to vector<32x1xf32>
    %141 = arith.addf %22, %137 : vector<32x128xf32>
    %142 = vector.shape_cast %140 : vector<32x1xf32> to vector<32x1xf32>
    %143 = vector.broadcast %142 : vector<32x1xf32> to vector<32x128xf32>
    %144 = arith.select %25, %143, %141 : vector<32x128xi1>, vector<32x128xf32>
    %c0_50 = arith.constant 0 : index
    %c256_51 = arith.constant 256 : index
    %145 = vector.load %arg7[%c0_50, %c256_51] : memref<32x384xf32, #tpu.memory_space<vmem>>, vector<32x128xf32>
    tpu.vector_store %arg7[%c0_50, %c256_51], %144 {strides = array<i32>} : memref<32x384xf32, #tpu.memory_space<vmem>>, vector<32x128xf32>,
    return
  }
  func.func @transform_0(%arg0: i32) -> (i32, i32) {
    %c0_i32 = arith.constant 0 : i32
    %c0_i32_0 = arith.constant 0 : i32
    return %arg0, %c0_i32 : i32, i32
  }
  func.func @transform_1(%arg0: i32) -> (i32, i32) {
    %c0_i32 = arith.constant 0 : i32
    %c0_i32_0 = arith.constant 0 : i32
    return %arg0, %c0_i32 : i32, i32
  }
  func.func @transform_2(%arg0: i32) -> (i32, i32) {
    %c0_i32 = arith.constant 0 : i32
    %c0_i32_0 = arith.constant 0 : i32
    return %arg0, %c0_i32 : i32, i32
  }
  func.func @transform_3(%arg0: i32) -> (i32, i32) {
    %c0_i32 = arith.constant 0 : i32
    %c0_i32_0 = arith.constant 0 : i32
    %c0_i32_1 = arith.constant 0 : i32
    return %c0_i32, %c0_i32_0 : i32, i32
  }
  func.func @transform_4(%arg0: i32) -> (i32, i32) {
    %c0_i32 = arith.constant 0 : i32
    %c0_i32_0 = arith.constant 0 : i32
    %c0_i32_1 = arith.constant 0 : i32
    return %c0_i32, %c0_i32_0 : i32, i32
  }
  func.func @transform_5(%arg0: i32) -> (i32, i32) {
    %c0_i32 = arith.constant 0 : i32
    %c0_i32_0 = arith.constant 0 : i32
    %c0_i32_1 = arith.constant 0 : i32
    return %c0_i32, %c0_i32_0 : i32, i32
  }
  func.func @transform_6(%arg0: i32) -> (i32, i32) {
    %c0_i32 = arith.constant 0 : i32
    %c0_i32_0 = arith.constant 0 : i32
    return %arg0, %c0_i32 : i32, i32
  }
}

</mosaic_0001>

<bundles_post_ra>
// kernel: ensemble_forward.1
= control target key start
LH: loop header
LB: loop body
LE: loop exit
PB: predicated region body
PF: predicated region fallthrough
CT: control target
= control target key end

     0   :  { %s1908_s21 = smov 0   ;;  %s2644_s0 = inlined_call_operand.vmem [shape: bf16[64,20], index: 0, kind: input, shape index: {}]   ;;  %s2645_s1 = inlined_call_operand.vmem [shape: f32[64,128], index: 1, kind: input, shape index: {}]   ;;  %s2646_s2 = inlined_call_operand.vmem [shape: f32[64,384], index: 2, kind: input, shape index: {}]   ;;  %s2647_s3 = inlined_call_operand.vmem [shape: bf16[20,96], index: 3, kind: input, shape index: {}]   ;;  %s2648_s4 = inlined_call_operand.vmem [shape: bf16[96,896], index: 4, kind: input, shape index: {}]   ;;  %s2649_s5 = inlined_call_operand.vmem [shape: f32[8,768], index: 5, kind: input, shape index: {}]   ;;  %s2650_s6 = inlined_call_operand.vmem [shape: f32[64,384], index: 6, kind: output, shape index: {}]  }
   0x1 LB: > { %s1560_s22 = sadd.s32 4294967295, %s1870_s21   ;;  %p1564_p0 = scmp.ge.s32.totalorder %s1870_s21, 1  ;;  %s1870_s21 = sphi %s1908_s21, %s16_s21  }
   0x2   : > { %p236_p1 = scmp.lt.s32.totalorder %s1870_s21, 3 }
   0x4   : > { %p237_p2 = pnand %p1564_p0, %p236_p1 }
   0x6   : > { %240 = sbr.rel (%p237_p2) target bundleno = 990 (0x3de), region = 44 }
   0xd   : > { %v1680_v0 = vld [vmem:[%s2647_s3] sm:$0xff]   ;;  %vm344_vm0 = vcmask 1041408   ;;  %v1681_v1 = vld [vmem:[%s2647_s3 + $0x8] ss:$0 sps:$4 sm:$0x33]   ;;  %s1565_s27 = sshll.u32 %s1560_s22, 2 }
   0xe   : > { %1645 = vmatprep.subr.bf16.mxu0 %v1680_v0  ;;  %p279_p3 = scmp.lt.s32.totalorder %s1565_s27, 7  ;;  %v346_v2 = vsel %vm344_vm0, %v1681_v1, 0  ;;  %v1684_v3 = vld [vmem:[%s2648_s4] ss:$28 sps:$4 sm:$0xff]   ;;  %v1685_v4 = vld [vmem:[%s2648_s4 + $0x38] ss:$28 sps:$4 sm:$0xff]  }
   0xf   : > { %1646 = vmatpush3.bf16.msra.mxu0 %v1680_v0  ;;  %1653 = vmatprep.subr.bf16.mxu1 %v1684_v3  ;;  %vm337_vm1 = vcmask 162816   ;;  %v1686_v5 = vld [vmem:[%s2648_s4 + $0x70] ss:$28 sps:$4 sm:$0xff]   ;;  %v1687_v8 = vld [vmem:[%s2648_s4 + $0xa8] ss:$28 sps:$4 sm:$0xff]   ;;  %vm451_vm2 = vcmask 785408  }
  0x10   : > { %1669 = vmatprep.subr.msk.bf16.mxu0 %vm344_vm0, %v1681_v1  ;;  %s2709_s27 = smov (!%p279_p3, %s1565_s27), 7  ;;  %1654 = vmatpush3.bf16.msra.mxu1 %v1684_v3  ;;  %v1688_v9 = vld [vmem:[%s2648_s4 + $0xe0] ss:$28 sps:$4 sm:$0xff]   ;;  %v1689_v10 = vld [vmem:[%s2648_s4 + $0x118] ss:$28 sps:$4 sm:$0xff]   ;;  %v1872_v51 = vmov 0  }
  0x11   : > { %s1566_s8 = sshll.u32 %s2709_s27, 2  ;;  %1655 = vmatprep.subr.bf16.mxu1 %v1685_v4  ;;  %v1690_v11 = vld [vmem:[%s2648_s4 + $0x4] ss:$28 sps:$4 sm:$0xff]   ;;  %v1695_v13 = vld [vmem:[%s2648_s4 + $0x10] ss:$28 sps:$4 sm:$0xff]   ;;  %s1670_s25 = smul.u32 24, %s2709_s27 }
  0x12   : > { %s282_s11 = scalar_lea.vmem %s2644_s0, %s1566_s8  ;;  %v1692_v12 = vld [vmem:[%s2648_s4 + $0x8] ss:$28 sps:$4 sm:$0xff]   ;;  %v1698_v14 = vld [vmem:[%s2648_s4 + $0x40] ss:$28 sps:$4 sm:$0xff]   ;;  %v1704_v16 = vld [vmem:[%s2648_s4 + $0x78] ss:$28 sps:$4 sm:$0xff]  }
  0x13   : > { %1648 = vmatpush3.bf16.msra.mxu0 %v346_v2  ;;  %v1682_v6 = vld [vmem:[%s282_s11] sm:$0xff]   ;;  %v1683_v7 = vld [vmem:[%s282_s11 + $0x8] sm:$0xff]   ;;  %v1696_v15 = vld [vmem:[%s2648_s4 + $0x3c] ss:$28 sps:$4 sm:$0xff]   ;;  %s2475_s29 = scalar_lea.vmem %s2646_s2, %s1670_s25  ;;  %s1568_s30 = sshll.u32 %s2709_s27, 3 }
  0x14   : > { %1649 = vmatprep.mubr.msk.bf16.mxu0 %vm337_vm1, %v1682_v6  ;;  %1656 = vmatpush3.bf16.msra.mxu1 %v1685_v4  ;;  %v1702_v17 = vld [vmem:[%s2648_s4 + $0x74] ss:$28 sps:$4 sm:$0xff]   ;;  %v1708_v19 = vld [vmem:[%s2648_s4 + $0xac] ss:$28 sps:$4 sm:$0xff]   ;;  %v309_v20 = vld [vmem:[%s2649_s5] ss:$0 sm:$0xff]  ;;  %s288_s9 = scalar_lea.vmem %s2645_s1, %s1568_s30  ;;  %s2605_s12 = scalar_lea.vmem %s2650_s6, %s1670_s25 }
  0x15   : > { %1657 = vmatprep.subr.bf16.mxu1 %v1686_v5  ;;  %766 = vmatprep.subr.bf16.mxu0 %v1692_v12  ;;  %v1710_v18 = vld [vmem:[%s2648_s4 + $0xb0] ss:$28 sps:$4 sm:$0xff]   ;;  %v1701_v36 = vld [vmem:[%s2648_s4 + $0x48] ss:$28 sps:$4 sm:$0xff]   ;;  %v1707_v38 = vld [vmem:[%s2648_s4 + $0x80] ss:$28 sps:$4 sm:$0xff]  }
  0x16   : > { %1650 = vmatmul.mubr.msk.bf16.vlgmr.msra.gmra.mrb[0].mxu0 %vm337_vm1, %v1683_v7  ;;  %v1693_v35 = vld [vmem:[%s2648_s4 + $0xc] ss:$28 sps:$4 sm:$0xff]   ;;  %v1699_v37 = vld [vmem:[%s2648_s4 + $0x44] ss:$28 sps:$4 sm:$0xff]   ;;  %v1705_v39 = vld [vmem:[%s2648_s4 + $0x7c] ss:$28 sps:$4 sm:$0xff]  }
  0x17   : > { %767 = vmatpush1.bf16.msra.mxu0 %v1690_v11  ;;  %v1713_v40 = vld [vmem:[%s2648_s4 + $0xb8] ss:$28 sps:$4 sm:$0xff]   ;;  %v1716_v42 = vld [vmem:[%s2648_s4 + $0xe8] ss:$28 sps:$4 sm:$0xff]   ;;  %v1719_v44 = vld [vmem:[%s2648_s4 + $0xf0] ss:$28 sps:$4 sm:$0xff]   ;;  %798 = vmatprep.mubr.bf16.mxu0 %v1872_v51 }
  0x18   : > { %1658 = vmatpush3.bf16.msra.mxu1 %v1686_v5  ;;  %768 = vmatprep.subr.bf16.mxu0 %v1698_v14  ;;  %v1711_v41 = vld [vmem:[%s2648_s4 + $0xb4] ss:$28 sps:$4 sm:$0xff]   ;;  %v1714_v43 = vld [vmem:[%s2648_s4 + $0xe4] ss:$28 sps:$4 sm:$0xff]   ;;  %v1717_v45 = vld [vmem:[%s2648_s4 + $0xec] ss:$28 sps:$4 sm:$0xff]   ;;  %v2651_v14 = vlaneseq }
  0x19   : > { %1659 = vmatprep.subr.bf16.mxu1 %v1687_v8  ;;  %v1722_v46 = vld [vmem:[%s2648_s4 + $0x120] ss:$28 sps:$4 sm:$0xff]   ;;  %v1725_v48 = vld [vmem:[%s2648_s4 + $0x128] ss:$28 sps:$4 sm:$0xff]   ;;  %v1728_v50 = vld [vmem:[%s2648_s4 + $0x18] ss:$28 sps:$4 sm:$0xff]  }
  0x1a   : > { %v1720_v47 = vld [vmem:[%s2648_s4 + $0x11c] ss:$28 sps:$4 sm:$0xff]   ;;  %v1723_v49 = vld [vmem:[%s2648_s4 + $0x124] ss:$28 sps:$4 sm:$0xff]   ;;  %v1726_v2 = vld [vmem:[%s2648_s4 + $0x14] ss:$28 sps:$4 sm:$0xff]  }
  0x1b   : > { %769 = vmatpush1.bf16.msra.mxu0 %v1696_v15  ;;  %v310_v52 = vld [vmem:[%s2649_s5 + $0x1] ss:$0 sm:$0xff]  ;;  %v1731_v4 = vld [vmem:[%s2648_s4 + $0x50] ss:$28 sps:$4 sm:$0xff]   ;;  %v1734_v6 = vld [vmem:[%s2648_s4 + $0x88] ss:$28 sps:$4 sm:$0xff]  }
  0x1c   : > { %1660 = vmatpush3.bf16.msra.mxu1 %v1687_v8  ;;  %770 = vmatprep.subr.bf16.mxu0 %v1704_v16  ;;  %v1729_v5 = vld [vmem:[%s2648_s4 + $0x4c] ss:$28 sps:$4 sm:$0xff]   ;;  %v1732_v7 = vld [vmem:[%s2648_s4 + $0x84] ss:$28 sps:$4 sm:$0xff]   ;;  %v1738_v11 = vld [vmem:[%s2648_s4 + $0xf4] ss:$28 sps:$4 sm:$0xff]  }
  0x1d   : > { %1661 = vmatprep.subr.bf16.mxu1 %v1688_v9  ;;  %v1737_v8 = vld [vmem:[%s2648_s4 + $0xc0] ss:$28 sps:$4 sm:$0xff]   ;;  %v1743_v12 = vld [vmem:[%s2648_s4 + $0x130] ss:$28 sps:$4 sm:$0xff]   ;;  %v2069_v15 = vshrl.u32 %v2651_v14, 7 }
  0x1e   : > { %v1573_v16 = vld [vmem:[%s2649_s5 + $0x2] ss:$8 sm:$0xf] }
  0x1f   : > { %771 = vmatpush1.bf16.msra.mxu0 %v1702_v17  ;;  %v1574_v17 = vld [vmem:[%s2649_s5 + $0x2] ss:$8 sm:$0x30] }
  0x20   : > { %1662 = vmatpush3.bf16.msra.mxu1 %v1688_v9  ;;  %772 = vmatprep.subr.bf16.mxu0 %v1710_v18  ;;  %v1735_v9 = vld [vmem:[%s2648_s4 + $0xbc] ss:$28 sps:$4 sm:$0xff]   ;;  %v2077_v18 = vor.u32 %v1574_v17, %v1573_v16  ;;  %v572_v16 = vsub.s32 5, %v2069_v15 }
  0x21   : > { %1663 = vmatprep.subr.bf16.mxu1 %v1689_v10 }
  0x23   : > { %773 = vmatpush1.bf16.msra.mxu0 %v1708_v19  ;;  %v556_v19 = vsub.s32 1, %v2069_v15 }
  0x24   : > { %1664 = vmatpush3.bf16.msra.mxu1 %v1689_v10  ;;  %774 = vmatprep.subr.bf16.mxu0 %v1716_v42  ;;  %v1740_v10 = vld [vmem:[%s2648_s4 + $0xf8] ss:$28 sps:$4 sm:$0xff]  }
  0x25   : > { %819 = vmatprep.subr.bf16.mxu1 %v1695_v13  ;;  %v1741_v13 = vld [vmem:[%s2648_s4 + $0x12c] ss:$28 sps:$4 sm:$0xff]  }
  0x27   : > { %775 = vmatpush1.bf16.msra.mxu0 %v1714_v43 }
  0x28   : > { %776 = vmatprep.subr.bf16.mxu0 %v1722_v46 }
  0x2b   : > { %777 = vmatpush1.bf16.msra.mxu0 %v1720_v47 }
  0x2c   : > { %872 = vmatprep.subr.bf16.mxu0 %v1728_v50 }
  0xe9   : > { %v1651_v21 = vpop.f32.mrb[0].mxu0 }
  0xea   : > { %v391_v22 = vadd.f32 %v1651_v21, %v309_v20  ;;  %v382_v23 = vpop.f32.mrb[1].mxu0  ;;  %v557_v21 = vrot.slane %v2077_v18, %v556_v19 }
  0xeb   : > { %v383_v24 = vadd.f32 %v382_v23, %v309_v20  ;;  %v1652_v25 = vpop.f32.mrb[2].mxu0 }
  0xec   : > { %v394_v26 = vadd.f32 %v1652_v25, %v309_v20  ;;  %v385_v27 = vpop.f32.mrb[3].mxu0  ;;  %v399_v29 = vmax.f32 %v391_v22, 0.0 }
  0xed   : > { %v386_v28 = vadd.f32 %v385_v27, %v309_v20  ;;  %v397_v31 = vmax.f32 %v383_v24, 0.0  ;;  %v564_v20 = vsub.s32 3, %v2069_v15 }
  0xee   : > { %v400_v30 = vmax.f32 %v394_v26, 0.0  ;;  %v2090_v26 = vld [vmem:[%s2649_s5 + $0x3] ss:$0 sm:$0xff] }
  0xef   : > { %v398_v32 = vmax.f32 %v386_v28, 0.0  ;;  %v565_v22 = vrot.slane %v2077_v18, %v564_v20  ;;  %v2095_v28 = vld [vmem:[%s2649_s5 + $0xb] ss:$0 sm:$0xff] }
  0xf0   : > { %v402_v33 = vpack.c.bf16 %v400_v30, %v399_v29 }
  0xf1   : > { %v401_v34 = vpack.c.bf16 %v398_v32, %v397_v31 }
  0xf3   : > { %1665 = vmatprep.mubr.msk.bf16.mxu1 %vm451_vm2, %v401_v34 }
  0xf4   : > { %1666 = vmatmul.mubr.msk.bf16.vlgmr.msra.gmra.mrb[0].mxu1 %vm451_vm2, %v402_v33 }
  0xf5   : > { %820 = vmatpush1.bf16.msra.mxu1 %v1693_v35  ;;  %851 = vmatprep.mubr.bf16.mxu1 %v1872_v51 }
  0xf6   : > { %821 = vmatprep.subr.bf16.mxu1 %v1701_v36 }
  0xf9   : > { %822 = vmatpush1.bf16.msra.mxu1 %v1699_v37 }
  0xfa   : > { %823 = vmatprep.subr.bf16.mxu1 %v1707_v38 }
  0xfd   : > { %824 = vmatpush1.bf16.msra.mxu1 %v1705_v39 }
  0xfe   : > { %825 = vmatprep.subr.bf16.mxu1 %v1713_v40 }
 0x101   : > { %826 = vmatpush1.bf16.msra.mxu1 %v1711_v41 }
 0x102   : > { %827 = vmatprep.subr.bf16.mxu1 %v1719_v44 }
 0x105   : > { %828 = vmatpush1.bf16.msra.mxu1 %v1717_v45 }
 0x106   : > { %829 = vmatprep.subr.bf16.mxu1 %v1725_v48 }
 0x109   : > { %830 = vmatpush1.bf16.msra.mxu1 %v1723_v49 }
 0x1c7   : > { %v1667_v53 = vpop.f32.mrb[0].mxu1 }
 0x1c8   : > { %v501_v54 = vadd.f32 %v1667_v53, %v310_v52  ;;  %v492_v55 = vpop.f32.mrb[1].mxu1 }
 0x1c9   : > { %v493_v56 = vadd.f32 %v492_v55, %v310_v52  ;;  %v1668_v57 = vpop.f32.mrb[2].mxu1 }
 0x1ca   : > { %v504_v58 = vadd.f32 %v1668_v57, %v310_v52  ;;  %v495_v59 = vpop.f32.mrb[3].mxu1  ;;  %v509_v61 = vmax.f32 %v501_v54, 0.0 }
 0x1cb   : > { %v496_v60 = vadd.f32 %v495_v59, %v310_v52  ;;  %v507_v63 = vmax.f32 %v493_v56, 0.0 }
 0x1cc   : > { %v510_v62 = vmax.f32 %v504_v58, 0.0 }
 0x1cd   : > { %v508_v0 = vmax.f32 %v496_v60, 0.0 }
 0x1ce   : > { %v512_v1 = vpack.c.bf16 %v510_v62, %v509_v61 }
 0x1cf   : > { %v511_v3 = vpack.c.bf16 %v508_v0, %v507_v63 }
 0x1d1   : > { %1625 = vmatmul.mubr.msk.bf16.vlgmr.msra.gmra.mrb[4].mxu0 %vm451_vm2, %v511_v3  ;;  %1627 = vmatmul.mubr.msk.bf16.vlgmr.msra.gmra.mrb[4].mxu1 %vm451_vm2, %v511_v3 }
 0x1d2   : > { %873 = vmatpush1.bf16.msra.mxu0 %v1726_v2  ;;  %808 = vmatprep.mubr.bf16.mxu0 %v1872_v51 }
 0x1d3   : > { %874 = vmatprep.subr.bf16.mxu0 %v1731_v4  ;;  %861 = vmatprep.mubr.bf16.mxu1 %v1872_v51 }
 0x1d6   : > { %875 = vmatpush1.bf16.msra.mxu0 %v1729_v5 }
 0x1d7   : > { %876 = vmatprep.subr.bf16.mxu0 %v1734_v6 }
 0x1d9   : > { %1626 = vmatmul.mubr.msk.bf16.gmra.mrb[8].mxu0 %vm451_vm2, %v512_v1  ;;  %1628 = vmatmul.mubr.msk.bf16.gmra.mrb[8].mxu1 %vm451_vm2, %v512_v1 }
 0x1da   : > { %877 = vmatpush1.bf16.msra.mxu0 %v1732_v7  ;;  %904 = vmatprep.mubr.bf16.mxu0 %v1872_v51 }
 0x1db   : > { %878 = vmatprep.subr.bf16.mxu0 %v1737_v8 }
 0x1de   : > { %879 = vmatpush1.bf16.msra.mxu0 %v1735_v9 }
 0x1df   : > { %880 = vmatprep.subr.bf16.mxu0 %v1740_v10 }
 0x1e2   : > { %881 = vmatpush1.bf16.msra.mxu0 %v1738_v11 }
 0x1e3   : > { %882 = vmatprep.subr.bf16.mxu0 %v1743_v12 }
 0x1e6   : > { %883 = vmatpush1.bf16.msra.mxu0 %v1741_v13 }
 0x1e9   : > { %1629 = vmatmul.mubr.msk.bf16.vlgmr.msra.gmra.mrb[12].mxu0 %vm451_vm2, %v511_v3 }
 0x1ea   : > { %914 = vmatprep.mubr.bf16.mxu0 %v1872_v51 }
 0x1f1   : > { %1630 = vmatmul.mubr.msk.bf16.gmra.mrb[16].mxu0 %vm451_vm2, %v512_v1 }
 0x2a4   : > { %v2083_v23 = vpop.f32.mrb[4].mxu0  ;;  %v2085_v24 = vpop.f32.mrb[4].mxu1 }
 0x2a5   : > { %v802_v25 = vpop.f32.mrb[5].mxu0  ;;  %v855_v27 = vpop.f32.mrb[5].mxu1 }
 0x2a6   : > { %v803_v29 = vadd.f32 %v802_v25, %v557_v21  ;;  %v856_v30 = vadd.f32 %v855_v27, %v565_v22  ;;  %v2097_v31 = vpop.f32.mrb[6].mxu0  ;;  %v2099_v32 = vpop.f32.mrb[6].mxu1 }
 0x2a7   : > { %v806_v33 = vpop.f32.mrb[7].mxu0  ;;  %v859_v34 = vpop.f32.mrb[7].mxu1 }
 0x2a8   : > { %v2102_v35 = vsub.f32 %v2090_v26, %v803_v29  ;;  %v2105_v36 = vsub.f32 %v2095_v28, %v856_v30  ;;  %v807_v37 = vadd.f32 %v806_v33, %v557_v21  ;;  %v860_v38 = vadd.f32 %v859_v34, %v565_v22 }
 0x2a9   : > { %v2146_v33 = vrot.slane %v2077_v18, %v572_v16 }
 0x2aa   : > { %v942_v39 = vand.u32 2147483647, %v2102_v35  ;;  %v1124_v40 = vand.u32 2147483647, %v2105_v36  ;;  %v2110_v41 = vsub.f32 %v2090_v26, %v807_v37  ;;  %v2113_v42 = vsub.f32 %v2095_v28, %v860_v38 }
 0x2ac   : > { %v946_v43 = vsub.f32 0.0, %v942_v39  ;;  %v1128_v44 = vsub.f32 0.0, %v1124_v40  ;;  %v2115_v45 = vpop.f32.mrb[8].mxu0  ;;  %v2117_v46 = vpop.f32.mrb[8].mxu1  ;;  %v943_v47 = vand.u32 2147483647, %v2110_v41 }
 0x2ad   : > { %v1125_v48 = vand.u32 2147483647, %v2113_v42  ;;  %v812_v51 = vpop.f32.mrb[9].mxu0  ;;  %v865_v52 = vpop.f32.mrb[9].mxu1 }
 0x2ae   : > { %v950_v49 = vmul.f32 1.442695, %v946_v43  ;;  %v1132_v50 = vmul.f32 1.442695, %v1128_v44  ;;  %v947_v53 = vsub.f32 0.0, %v943_v47  ;;  %v813_v55 = vadd.f32 %v812_v51, %v557_v21  ;;  %v2121_v57 = vpop.f32.mrb[10].mxu0 }
 0x2af   : > { %v1129_v54 = vsub.f32 0.0, %v1125_v48  ;;  %v866_v56 = vadd.f32 %v865_v52, %v565_v22  ;;  %v2123_v58 = vpop.f32.mrb[10].mxu1  ;;  %v816_v59 = vpop.f32.mrb[11].mxu0  ;;  %v938_v51 = vmax.f32 %v2102_v35, 0.0  ;;  %v1120_v52 = vmax.f32 %v2105_v36, 0.0 }
 0x2b0   : > { %1744 = vpow2.f32 %v950_v49  ;;  %v869_v60 = vpop.f32.mrb[11].mxu1  ;;  %v952_v61 = vmul.f32 1.442695, %v947_v53  ;;  %v2126_v63 = vsub.f32 %v2090_v26, %v813_v55  ;;  %v817_v1 = vadd.f32 %v816_v59, %v557_v21 }
 0x2b1   : > { %1746 = vpow2.f32 %v1132_v50  ;;  %v1134_v62 = vmul.f32 1.442695, %v1129_v54  ;;  %v2129_v0 = vsub.f32 %v2095_v28, %v866_v56  ;;  %v870_v2 = vadd.f32 %v869_v60, %v565_v22  ;;  %v2162_v54 = vld [vmem:[%s2649_s5 + $0x13] ss:$0 sm:$0xff] }
 0x2b2   : > { %1748 = vpow2.f32 %v952_v61  ;;  %v944_v3 = vand.u32 2147483647, %v2126_v63  ;;  %v2134_v5 = vsub.f32 %v2090_v26, %v817_v1  ;;  %v560_v22 = vsub.s32 2, %v2069_v15 }
 0x2b3   : > { %1750 = vpow2.f32 %v1134_v62  ;;  %v1126_v4 = vand.u32 2147483647, %v2129_v0  ;;  %v2137_v7 = vsub.f32 %v2095_v28, %v870_v2  ;;  %v939_v56 = vmax.f32 %v2110_v41, 0.0 }
 0x2b4   : > { %v948_v6 = vsub.f32 0.0, %v944_v3  ;;  %v945_v9 = vand.u32 2147483647, %v2134_v5  ;;  %v2154_v47 = vrot.slane %v2077_v18, %v560_v22  ;;  %v1121_v62 = vmax.f32 %v2113_v42, 0.0  ;;  %v2253_v42 = vld [vmem:[%s2649_s5 + $0x4] ss:$0 sm:$0xff] }
 0x2b5   : > { %v1130_v8 = vsub.f32 0.0, %v1126_v4  ;;  %v1127_v11 = vand.u32 2147483647, %v2137_v7 }
 0x2b6   : > { %v954_v10 = vmul.f32 1.442695, %v948_v6  ;;  %v949_v13 = vsub.f32 0.0, %v945_v9  ;;  %v940_v9 = vmax.f32 %v2126_v63, 0.0  ;;  %v2670_v63 = vmax.f32 %v2129_v0, 0.0 }
 0x2b7   : > { %v1136_v12 = vmul.f32 1.442695, %v1130_v8  ;;  %v1131_v20 = vsub.f32 0.0, %v1127_v11 }
 0x2b8   : > { %1752 = vpow2.f32 %v954_v10  ;;  %v956_v19 = vmul.f32 1.442695, %v949_v13 }
 0x2b9   : > { %1754 = vpow2.f32 %v1136_v12  ;;  %v1138_v40 = vmul.f32 1.442695, %v1131_v20 }
 0x2ba   : > { %v1745_v17 = vpop.eup %1744  ;;  %1756 = vpow2.f32 %v956_v19 }
 0x2bb   : > { %v1747_v21 = vpop.eup %1746  ;;  %v958_v25 = vadd.f32 1.0, %v1745_v17  ;;  %v961_v38 = vmul.f32 -0.5, %v1745_v17  ;;  %v964_v55 = vand.u32 2147483647, %v1745_v17 }
 0x2bc   : > { %v1140_v27 = vadd.f32 1.0, %v1747_v21  ;;  %v2143_v29 = vpop.f32.mrb[12].mxu0  ;;  %v1749_v30 = vpop.eup %1748  ;;  %v1143_v48 = vmul.f32 -0.5, %v1747_v21  ;;  %v1146_v61 = vand.u32 2147483647, %v1747_v21 }
 0x2bd   : > { %2652 = vst [vmem:[#allocation2_spill] sm:$0xff] %v2143_v29  ;;  %1758 = vlog2.f32 %v958_v25  ;;  %v908_v34 = vpop.f32.mrb[13].mxu0  ;;  %v2148_v37 = vpop.eup %1750  ;;  %v967_v39 = vadd.f32 1.0, %v1749_v30  ;;  %v970_v53 = vmul.f32 -0.5, %v1749_v30  ;;  %v962_v60 = vadd.f32 1.0, %v961_v38 }
 0x2be   : > { %1760 = vlog2.f32 %v1140_v27  ;;  %v2150_v43 = vpop.f32.mrb[14].mxu0  ;;  %v1149_v49 = vadd.f32 1.0, %v2148_v37  ;;  %v909_v59 = vadd.f32 %v908_v34, %v2146_v33  ;;  %v1144_v36 = vadd.f32 1.0, %v1143_v48 }
 0x2bf   : > { %2653 = vst [vmem:[#allocation3_spill] sm:$0xff] %v2150_v43  ;;  %v912_v50 = vpop.f32.mrb[15].mxu0  ;;  %1762 = vlog2.f32 %v967_v39  ;;  %v973_v1 = vand.u32 2147483647, %v1749_v30  ;;  %v1152_v2 = vmul.f32 -0.5, %v2148_v37  ;;  %v971_v6 = vadd.f32 1.0, %v970_v53 }
 0x2c0   : > { %1764 = vlog2.f32 %v1149_v49  ;;  %v2171_v3 = vsub.f32 %v2162_v54, %v909_v59  ;;  %v1155_v8 = vand.u32 2147483647, %v2148_v37  ;;  %vm2180_vm3 = vcmp.lt.f32.partialorder %v964_v55, 0.0004427343 }
 0x2c1   : > { %1766 = vpow2.f32 %v1138_v40  ;;  %v963_v25 = vmul.f32 %v1745_v17, %v962_v60  ;;  %vm2191_vm4 = vcmp.lt.f32.partialorder %v1146_v61, 0.0004427343  ;;  %v1145_v40 = vmul.f32 %v1747_v21, %v1144_v36 }
 0x2c2   : > { %v2167_v35 = vpop.eup %1752  ;;  %v1306_v34 = vand.u32 2147483647, %v2171_v3  ;;  %v1153_v48 = vadd.f32 1.0, %v1152_v2  ;;  %v972_v17 = vmul.f32 %v1749_v30, %v971_v6  ;;  %vm2201_vm5 = vcmp.lt.f32.partialorder %v973_v1, 0.0004427343 }
 0x2c3   : > { %v2173_v4 = vpop.eup %1754  ;;  %v976_v10 = vadd.f32 1.0, %v2167_v35  ;;  %vm2205_vm6 = vcmp.lt.f32.partialorder %v1155_v8, 0.0004427343  ;;  %v979_v21 = vmul.f32 -0.5, %v2167_v35  ;;  %v982_v36 = vand.u32 2147483647, %v2167_v35 }
 0x2c4   : > { %v2178_v11 = vpop.f32.mrb[16].mxu0  ;;  %v1158_v16 = vadd.f32 1.0, %v2173_v4  ;;  %v2189_v22 = vpop.eup %1756  ;;  %v1310_v2 = vsub.f32 0.0, %v1306_v34  ;;  %v1161_v30 = vmul.f32 -0.5, %v2173_v4  ;;  %v913_v1 = vadd.f32 %v912_v50, %v2146_v33 }
 0x2c5   : > { %2654 = vst [vmem:[#allocation4_spill] sm:$0xff] %v2178_v11  ;;  %v2187_v20 = vpop.f32.mrb[17].mxu0  ;;  %1768 = vlog2.f32 %v976_v10  ;;  %v985_v49 = vadd.f32 1.0, %v2189_v22  ;;  %v1164_v44 = vand.u32 2147483647, %v2173_v4  ;;  %v980_v27 = vadd.f32 1.0, %v979_v21 }
 0x2c6   : > { %v2196_v38 = vpop.f32.mrb[18].mxu0  ;;  %1770 = vlog2.f32 %v1158_v16  ;;  %vm2228_vm7 = vcmp.lt.f32.partialorder %v982_v36, 0.0004427343  ;;  %v988_v60 = vmul.f32 -0.5, %v2189_v22 }
 0x2c7   : > { %2659 = vst [vmem:[#allocation5_spill] sm:$0xff] %v2196_v38  ;;  %v1759_v39 = vpop.eup %1758  ;;  %v2199_v53 = vpop.f32.mrb[19].mxu0  ;;  %1772 = vlog2.f32 %v985_v49  ;;  %v2224_v49 = vld [vmem:[%s2649_s5 + $0xc] ss:$0 sm:$0xff]  ;;  %vm2240_vm8 = vcmp.lt.f32.partialorder %v1164_v44, 0.0004427343  ;;  %v981_v21 = vmul.f32 %v2167_v35, %v980_v27 }
 0x2c8   : > { %v1761_v55 = vpop.eup %1760  ;;  %v960_v59 = vmul.f32 0.6931472, %v1759_v39 }
 0x2c9   : > { %v1142_v10 = vmul.f32 0.6931472, %v1761_v55  ;;  %v1763_v16 = vpop.eup %1762  ;;  %v1154_v55 = vmul.f32 %v2148_v37, %v1153_v48  ;;  %v1162_v48 = vadd.f32 1.0, %v1161_v30 }
 0x2ca   : > { %v966_v14 = vsel %vm2180_vm3, %v963_v25, %v960_v59  ;;  %v1765_v6 = vpop.eup %1764  ;;  %v969_v39 = vmul.f32 0.6931472, %v1763_v16  ;;  %v1314_v25 = vmul.f32 1.442695, %v1310_v2 }
 0x2cb   : > { %v1148_v8 = vsel %vm2191_vm4, %v1145_v40, %v1142_v10  ;;  %v2219_v19 = vpop.eup %1766  ;;  %v994_v34 = vadd.f32 %v966_v14, %v938_v51  ;;  %v1151_v12 = vmul.f32 0.6931472, %v1765_v6  ;;  %v1163_v6 = vmul.f32 %v2173_v4, %v1162_v48 }
 0x2cc   : > { %v1176_v13 = vadd.f32 %v1148_v8, %v1120_v52  ;;  %v975_v50 = vsel %vm2201_vm5, %v972_v17, %v969_v39  ;;  %v1167_v37 = vadd.f32 1.0, %v2219_v19  ;;  %v1170_v36 = vmul.f32 -0.5, %v2219_v19 }
 0x2cd   : > { %v995_v51 = vadd.f32 %v975_v50, %v939_v56  ;;  %v1157_v52 = vsel %vm2205_vm6, %v1154_v55, %v1151_v12  ;;  %v991_v56 = vand.u32 2147483647, %v2189_v22  ;;  %v989_v55 = vadd.f32 1.0, %v988_v60 }
 0x2ce   : > { %v1180_v14 = vsub.f32 %v2095_v28, %v1176_v13  ;;  %v1177_v59 = vadd.f32 %v1157_v52, %v1121_v62  ;;  %1774 = vlog2.f32 %v1167_v37  ;;  %v998_v13 = vsub.f32 %v2090_v26, %v994_v34 }
 0x2cf   : > { %v1769_v10 = vpop.eup %1768  ;;  %1776 = vpow2.f32 %v1314_v25  ;;  %v999_v16 = vsub.f32 %v2090_v26, %v995_v51  ;;  %v2267_v34 = vsub.f32 %v2162_v54, %v913_v1  ;;  %vm2274_vm9 = vcmp.lt.f32.partialorder %v991_v56, 0.0004427343 }
 0x2d0   : > { %v2247_v41 = vsub.f32 %v1180_v14, %v2224_v49  ;;  %v1771_v61 = vpop.eup %1770  ;;  %v1181_v44 = vsub.f32 %v2095_v28, %v1177_v59  ;;  %v978_v62 = vmul.f32 0.6931472, %v1769_v10  ;;  %v2270_v12 = vsub.f32 %v998_v13, %v2253_v42 }
 0x2d1   : > { %v1160_v30 = vmul.f32 0.6931472, %v1771_v61  ;;  %v1773_v35 = vpop.eup %1772  ;;  %v1171_v37 = vadd.f32 1.0, %v1170_v36  ;;  %v1173_v1 = vand.u32 2147483647, %v2219_v19  ;;  %v2283_v51 = vsub.f32 %v999_v16, %v2253_v42 }
 0x2d2   : > { %v1192_v2 = vand.u32 2147483647, %v2247_v41  ;;  %v2262_v8 = vsub.f32 %v1181_v44, %v2224_v49  ;;  %v984_v39 = vsel %vm2228_vm7, %v981_v21, %v978_v62  ;;  %v987_v59 = vmul.f32 0.6931472, %v1773_v35 }
 0x2d3   : > { %v996_v50 = vadd.f32 %v984_v39, %v940_v9  ;;  %v1166_v40 = vsel %vm2240_vm8, %v1163_v6, %v1160_v30  ;;  %v990_v60 = vmul.f32 %v2189_v22, %v989_v55  ;;  %v1307_v10 = vand.u32 2147483647, %v2267_v34 }
 0x2d4   : > { %v1196_v25 = vsub.f32 0.0, %v1192_v2  ;;  %v1193_v27 = vand.u32 2147483647, %v2262_v8  ;;  %v1178_v9 = vadd.f32 %v1166_v40, %v2670_v63  ;;  %v1010_v17 = vand.u32 2147483647, %v2270_v12 }
 0x2d5   : > { %v1000_v52 = vsub.f32 %v2090_v26, %v996_v50  ;;  %v993_v0 = vsel %vm2274_vm9, %v990_v60, %v987_v59  ;;  %v1123_v62 = vmax.f32 %v2137_v7, 0.0  ;;  %v1172_v21 = vmul.f32 %v2219_v19, %v1171_v37 }
 0x2d6   : > { %v1200_v14 = vmul.f32 1.442695, %v1196_v25  ;;  %v1197_v48 = vsub.f32 0.0, %v1193_v27  ;;  %v1182_v56 = vsub.f32 %v2095_v28, %v1178_v9  ;;  %v1011_v36 = vand.u32 2147483647, %v2283_v51 }
 0x2d7   : > { %v2292_v13 = vsub.f32 %v1000_v52, %v2253_v42  ;;  %v1311_v30 = vsub.f32 0.0, %v1307_v10  ;;  %v2671_v6 = vmax.f32 %v2134_v5, 0.0  ;;  %v1014_v7 = vsub.f32 0.0, %v1010_v17 }
 0x2d8   : > { %1778 = vpow2.f32 %v1200_v14  ;;  %v1775_v61 = vpop.eup %1774  ;;  %v1202_v44 = vmul.f32 1.442695, %v1197_v48  ;;  %v2304_v16 = vsub.f32 %v1182_v56, %v2224_v49  ;;  %vm1174_vm10 = vcmp.lt.f32.partialorder %v1173_v1, 0.0004427343 }
 0x2d9   : > { %v2299_v22 = vpop.eup %1776  ;;  %v1012_v2 = vand.u32 2147483647, %v2292_v13  ;;  %v997_v39 = vadd.f32 %v993_v0, %v2671_v6  ;;  %v1169_v55 = vmul.f32 0.6931472, %v1775_v61  ;;  %v2312_v50 = vadd.f32 %v2085_v24, %v2154_v47 }
 0x2da   : > { %1780 = vpow2.f32 %v1202_v44  ;;  %v1322_v35 = vadd.f32 1.0, %v2299_v22  ;;  %v1194_v19 = vand.u32 2147483647, %v2304_v16  ;;  %v1015_v40 = vsub.f32 0.0, %v1011_v36 }
 0x2db   : > { %v1016_v25 = vsub.f32 0.0, %v1012_v2  ;;  %v1001_v4 = vsub.f32 %v2090_v26, %v997_v39  ;;  %v1175_v27 = vsel %vm1174_vm10, %v1172_v21, %v1169_v55  ;;  %v1302_v63 = vmax.f32 %v2171_v3, 0.0 }
 0x2dc   : > { %1782 = vlog2.f32 %v1322_v35  ;;  %v1198_v5 = vsub.f32 0.0, %v1194_v19  ;;  %v1179_v14 = vadd.f32 %v1175_v27, %v1123_v62  ;;  %v1316_v9 = vmul.f32 1.442695, %v1311_v30 }
 0x2dd   : > { %v1022_v37 = vmul.f32 1.442695, %v1016_v25  ;;  %v2316_v52 = vsub.f32 %v1001_v4, %v2253_v42  ;;  %v919_v1 = vadd.f32 %v2187_v20, %v2146_v33  ;;  %v1018_v48 = vmul.f32 1.442695, %v1014_v7 }
 0x2de   : > { %v1204_v24 = vmul.f32 1.442695, %v1198_v5  ;;  %v1183_v26 = vsub.f32 %v2095_v28, %v1179_v14  ;;  %v1325_v60 = vmul.f32 -0.5, %v2299_v22  ;;  %v1020_v56 = vmul.f32 1.442695, %v1015_v40 }
 0x2df   : > { %1784 = vpow2.f32 %v1022_v37  ;;  %v1013_v59 = vand.u32 2147483647, %v2316_v52  ;;  %v2325_v10 = vsub.f32 %v2162_v54, %v919_v1  ;;  %v1328_v21 = vand.u32 2147483647, %v2299_v22 }
 0x2e0   : > { %1786 = vpow2.f32 %v1316_v9  ;;  %v2328_v3 = vsub.f32 %v1183_v26, %v2224_v49  ;;  %v1326_v6 = vadd.f32 1.0, %v1325_v60  ;;  %v923_v39 = vadd.f32 %v2199_v53, %v2146_v33 }
 0x2e1   : > { %1788 = vpow2.f32 %v1204_v24  ;;  %v1017_v0 = vsub.f32 0.0, %v1013_v59  ;;  %v1308_v36 = vand.u32 2147483647, %v2325_v10  ;;  %vm1329_vm11 = vcmp.lt.f32.partialorder %v1328_v21, 0.0004427343 }
 0x2e2   : > { %v1779_v17 = vpop.eup %1778  ;;  %1790 = vpow2.f32 %v1018_v48  ;;  %v1195_v62 = vand.u32 2147483647, %v2328_v3  ;;  %v1327_v33 = vmul.f32 %v2299_v22, %v1326_v6  ;;  %v2347_v53 = vsub.f32 %v2162_v54, %v923_v39  ;;  %v2359_v39 = vld [vmem:[%s2649_s5 + $0x14] ss:$0 sm:$0xff] }
 0x2e3   : > { %v1208_v44 = vadd.f32 1.0, %v1779_v17  ;;  %v1024_v30 = vmul.f32 1.442695, %v1017_v0  ;;  %v1211_v19 = vmul.f32 -0.5, %v1779_v17  ;;  %v1312_v5 = vsub.f32 0.0, %v1308_v36 }
 0x2e4   : > { %v2336_v2 = vpop.eup %1780  ;;  %v1199_v7 = vsub.f32 0.0, %v1195_v62  ;;  %v1214_v1 = vand.u32 2147483647, %v1779_v17 }
 0x2e5   : > { %1792 = vlog2.f32 %v1208_v44  ;;  %v1217_v35 = vadd.f32 1.0, %v2336_v2  ;;  %v1212_v59 = vadd.f32 1.0, %v1211_v19  ;;  %v1220_v60 = vmul.f32 -0.5, %v2336_v2 }
 0x2e6   : > { %1794 = vpow2.f32 %v1020_v56  ;;  %v1783_v25 = vpop.eup %1782  ;;  %v1206_v37 = vmul.f32 1.442695, %v1199_v7  ;;  %v1223_v22 = vand.u32 2147483647, %v2336_v2  ;;  %v1318_v36 = vmul.f32 1.442695, %v1312_v5 }
 0x2e7   : > { %1796 = vpow2.f32 %v1024_v30  ;;  %v1324_v14 = vmul.f32 0.6931472, %v1783_v25  ;;  %vm2364_vm12 = vcmp.lt.f32.partialorder %v1214_v1, 0.0004427343  ;;  %v1213_v5 = vmul.f32 %v1779_v17, %v1212_v59 }
 0x2e8   : > { %1798 = vlog2.f32 %v1217_v35  ;;  %v1309_v35 = vand.u32 2147483647, %v2347_v53  ;;  %vm2372_vm13 = vcmp.lt.f32.partialorder %v1223_v22, 0.0004427343 }
 0x2e9   : > { %v1785_v9 = vpop.eup %1784  ;;  %1800 = vpow2.f32 %v1206_v37  ;;  %v1330_v44 = vsel %vm1329_vm11, %v1327_v33, %v1324_v14  ;;  %v1221_v14 = vadd.f32 1.0, %v1220_v60 }
 0x2ea   : > { %v1787_v26 = vpop.eup %1786  ;;  %v1044_v56 = vadd.f32 1.0, %v1785_v9  ;;  %v1358_v62 = vadd.f32 %v1330_v44, %v1302_v63  ;;  %v1047_v30 = vmul.f32 -0.5, %v1785_v9  ;;  %v1050_v1 = vand.u32 2147483647, %v1785_v9 }
 0x2eb   : > { %v2352_v0 = vpop.eup %1788  ;;  %v1331_v21 = vadd.f32 1.0, %v1787_v26  ;;  %v1334_v33 = vmul.f32 -0.5, %v1787_v26  ;;  %v1337_v61 = vand.u32 2147483647, %v1787_v26  ;;  %v1313_v17 = vsub.f32 0.0, %v1309_v35 }
 0x2ec   : > { %1802 = vlog2.f32 %v1044_v56  ;;  %v1226_v6 = vadd.f32 1.0, %v2352_v0  ;;  %v2362_v7 = vpop.eup %1790  ;;  %v1362_v63 = vsub.f32 %v2162_v54, %v1358_v62  ;;  %v1229_v19 = vmul.f32 -0.5, %v2352_v0 }
 0x2ed   : > { %1804 = vlog2.f32 %v1331_v21  ;;  %v1048_v21 = vadd.f32 1.0, %v1047_v30  ;;  %v1026_v22 = vadd.f32 1.0, %v2362_v7  ;;  %v1222_v27 = vmul.f32 %v2336_v2, %v1221_v14 }
 0x2ee   : > { %1806 = vlog2.f32 %v1226_v6  ;;  %v2377_v55 = vsub.f32 %v1362_v63, %v2359_v39  ;;  %v1232_v6 = vand.u32 2147483647, %v2352_v0  ;;  %v1335_v63 = vadd.f32 1.0, %v1334_v33 }
 0x2ef   : > { %v1793_v37 = vpop.eup %1792  ;;  %1808 = vpow2.f32 %v1318_v36  ;;  %v1320_v4 = vmul.f32 1.442695, %v1313_v17  ;;  %v1029_v36 = vmul.f32 -0.5, %v2362_v7  ;;  %v1049_v35 = vmul.f32 %v1785_v9, %v1048_v21 }
 0x2f0   : > { %v2370_v56 = vpop.eup %1794  ;;  %v1210_v60 = vmul.f32 0.6931472, %v1793_v37  ;;  %v1374_v30 = vand.u32 2147483647, %v2377_v55  ;;  %v1230_v28 = vadd.f32 1.0, %v1229_v19  ;;  %v1336_v21 = vmul.f32 %v1787_v26, %v1335_v63 }
 0x2f1   : > { %v1797_v62 = vpop.eup %1796  ;;  %vm2385_vm14 = vcmp.lt.f32.partialorder %v1337_v61, 0.0004427343  ;;  %vm2391_vm15 = vcmp.lt.f32.partialorder %v1050_v1, 0.0004427343  ;;  %vm2395_vm0 = vcmp.lt.f32.partialorder %v1232_v6, 0.0004427343 }
 0x2f2   : > { %v1799_v59 = vpop.eup %1798  ;;  %v1053_v24 = vadd.f32 1.0, %v1797_v62  ;;  %v1056_v40 = vmul.f32 -0.5, %v1797_v62  ;;  %v1059_v14 = vand.u32 2147483647, %v1797_v62  ;;  %v1378_v33 = vsub.f32 0.0, %v1374_v30 }
 0x2f3   : > { %v1219_v48 = vmul.f32 0.6931472, %v1799_v59  ;;  %v1801_v20 = vpop.eup %1800  ;;  %v1216_v59 = vsel %vm2364_vm12, %v1213_v5, %v1210_v60  ;;  %v1030_v1 = vadd.f32 1.0, %v1029_v36  ;;  %v2682_v6 = vmax.f32 %v2247_v41, 0.0 }
 0x2f4   : > { %1810 = vlog2.f32 %v1053_v24  ;;  %v1235_v37 = vadd.f32 1.0, %v1801_v20  ;;  %v1057_v19 = vadd.f32 1.0, %v1056_v40  ;;  %v1238_v25 = vmul.f32 -0.5, %v1801_v20 }
 0x2f5   : > { %v1225_v61 = vsel %vm2372_vm13, %v1222_v27, %v1219_v48  ;;  %v1382_v5 = vmul.f32 1.442695, %v1378_v33  ;;  %v1244_v11 = vadd.f32 %v1216_v59, %v2682_v6  ;;  %v1231_v43 = vmul.f32 %v2352_v0, %v1230_v28 }
 0x2f6   : > { %v1803_v9 = vpop.eup %1802  ;;  %1812 = vlog2.f32 %v1235_v37  ;;  %v2683_v30 = vmax.f32 %v2262_v8, 0.0  ;;  %vm2406_vm1 = vcmp.lt.f32.partialorder %v1059_v14, 0.0004427343  ;;  %v1058_v63 = vmul.f32 %v1797_v62, %v1057_v19 }
 0x2f7   : > { %v1805_v17 = vpop.eup %1804  ;;  %1814 = vpow2.f32 %v1320_v4  ;;  %v1035_v4 = vadd.f32 1.0, %v2370_v56  ;;  %v1046_v26 = vmul.f32 0.6931472, %v1803_v9  ;;  %v1241_v41 = vand.u32 2147483647, %v1801_v20 }
 0x2f8   : > { %v1807_v60 = vpop.eup %1806  ;;  %v1333_v29 = vmul.f32 0.6931472, %v1805_v17  ;;  %1816 = vlog2.f32 %v1026_v22  ;;  %v1245_v44 = vadd.f32 %v1225_v61, %v2683_v30  ;;  %v1239_v8 = vadd.f32 1.0, %v1238_v25 }
 0x2f9   : > { %v1228_v27 = vmul.f32 0.6931472, %v1807_v60  ;;  %1818 = vpow2.f32 %v1382_v5  ;;  %v1809_v48 = vpop.eup %1808  ;;  %v2686_v22 = vmax.f32 %v2267_v34, 0.0  ;;  %v2687_v59 = vmax.f32 %v2304_v16, 0.0 }
 0x2fa   : > { %v1339_v28 = vsel %vm2385_vm14, %v1336_v21, %v1333_v29  ;;  %v1340_v37 = vadd.f32 1.0, %v1809_v48  ;;  %v1032_v33 = vand.u32 2147483647, %v2362_v7  ;;  %1820 = vlog2.f32 %v1035_v4 }
 0x2fb   : > { %v1234_v0 = vsel %vm2395_vm0, %v1231_v43, %v1228_v27  ;;  %v1359_v36 = vadd.f32 %v1339_v28, %v2686_v22  ;;  %v1038_v62 = vmul.f32 -0.5, %v2370_v56  ;;  %v1343_v29 = vmul.f32 -0.5, %v1809_v48 }
 0x2fc   : > { %v1246_v14 = vadd.f32 %v1234_v0, %v2687_v59  ;;  %1822 = vlog2.f32 %v1340_v37  ;;  %v1031_v43 = vmul.f32 %v2362_v7, %v1030_v1  ;;  %v1052_v34 = vsel %vm2391_vm15, %v1049_v35, %v1046_v26 }
 0x2fd   : > { %v1363_v38 = vsub.f32 %v2162_v54, %v1359_v36  ;;  %v1041_v61 = vand.u32 2147483647, %v2370_v56  ;;  %v1248_v16 = vadd.f32 %v1244_v11, %v2224_v49  ;;  %v1240_v19 = vmul.f32 %v1801_v20, %v1239_v8 }
 0x2fe   : > { %v1811_v9 = vpop.eup %1810  ;;  %vm2427_vm2 = vcmp.lt.f32.partialorder %v1241_v41, 0.0004427343  ;;  %v1346_v25 = vand.u32 2147483647, %v1809_v48  ;;  %vm2434_vm3 = vcmp.lt.f32.partialorder %v1032_v33, 0.0004427343  ;;  %v1250_v1 = vadd.f32 %v1246_v14, %v2224_v49 }
 0x2ff   : > { %v1055_v24 = vmul.f32 0.6931472, %v1811_v9  ;;  %v2432_v17 = vsub.f32 %v1363_v38, %v2359_v39  ;;  %v1039_v35 = vadd.f32 1.0, %v1038_v62  ;;  %v1252_v2 = vmul.f32 1.442695, %v1248_v16 }
 0x300   : > { %v1813_v5 = vpop.eup %1812  ;;  %v2692_v20 = vmax.f32 %v2292_v13, 0.0  ;;  %v1344_v27 = vadd.f32 1.0, %v1343_v29  ;;  %vm2447_vm4 = vcmp.lt.f32.partialorder %v1041_v61, 0.0004427343  ;;  %vm2456_vm5 = vcmp.lt.f32.partialorder %v1346_v25, 0.0004427343 }
 0x301   : > { %v2439_v11 = vpop.eup %1814  ;;  %v1237_v6 = vmul.f32 0.6931472, %v1813_v5  ;;  %v1375_v30 = vand.u32 2147483647, %v2432_v17  ;;  %v1061_v26 = vsel %vm2406_vm1, %v1058_v63, %v1055_v24  ;;  %1824 = vpow2.f32 %v1252_v2 }
 0x302   : > { %v1064_v60 = vadd.f32 %v1052_v34, %v2692_v20  ;;  %v1817_v4 = vpop.eup %1816  ;;  %v1349_v41 = vadd.f32 1.0, %v2439_v11  ;;  %v1040_v36 = vmul.f32 %v2370_v56, %v1039_v35  ;;  %v1256_v37 = vmul.f32 1.442695, %v1250_v1  ;;  %v1260_v20 = vld [vmem:[%s2475_s29 + $0x8] sm:$0xff] }
 0x303   : > { %v2451_v0 = vpop.eup %1818  ;;  %v1243_v13 = vsel %vm2427_vm2, %v1240_v19, %v1237_v6  ;;  %v1379_v8 = vsub.f32 0.0, %v1375_v30  ;;  %v1028_v40 = vmul.f32 0.6931472, %v1817_v4  ;;  %v1249_v59 = vadd.f32 %v1245_v44, %v2224_v49 }
 0x304   : > { %v1390_v63 = vadd.f32 1.0, %v2451_v0  ;;  %v2697_v14 = vmax.f32 %v2316_v52, 0.0  ;;  %1826 = vlog2.f32 %v1349_v41  ;;  %v1068_v9 = vadd.f32 %v1064_v60, %v2253_v42  ;;  %v1821_v38 = vpop.eup %1820 }
 0x305   : > { %v1384_v62 = vmul.f32 1.442695, %v1379_v8  ;;  %v2698_v29 = vmax.f32 %v2328_v3, 0.0  ;;  %v1345_v24 = vmul.f32 %v1809_v48, %v1344_v27  ;;  %v1034_v61 = vsel %vm2434_vm3, %v1031_v43, %v1028_v40 }
 0x306   : > { %v1065_v33 = vadd.f32 %v1061_v26, %v2697_v14  ;;  %1828 = vlog2.f32 %v1390_v63  ;;  %v1823_v56 = vpop.eup %1822  ;;  %v1352_v52 = vmul.f32 -0.5, %v2439_v11  ;;  %v2699_v44 = vmax.f32 %v2270_v12, 0.0 }
 0x307   : > { %v1247_v34 = vadd.f32 %v1243_v13, %v2698_v29  ;;  %1830 = vpow2.f32 %v1384_v62  ;;  %v1037_v16 = vmul.f32 0.6931472, %v1821_v38  ;;  %v1393_v48 = vmul.f32 -0.5, %v2451_v0 }
 0x308   : > { %v1062_v3 = vadd.f32 %v1034_v61, %v2699_v44  ;;  %v1342_v19 = vmul.f32 0.6931472, %v1823_v56  ;;  %1832 = vpow2.f32 %v1256_v37  ;;  %v1254_v43 = vmul.f32 1.442695, %v1249_v59 }
 0x309   : > { %v1043_v25 = vsel %vm2447_vm4, %v1040_v36, %v1037_v16  ;;  %v1069_v5 = vadd.f32 %v1065_v33, %v2253_v42  ;;  %v1074_v7 = vmul.f32 1.442695, %v1068_v9  ;;  %v2700_v12 = vmax.f32 %v2283_v51, 0.0 }
 0x30a   : > { %v1066_v21 = vadd.f32 %v1062_v3, %v2253_v42  ;;  %v1348_v35 = vsel %vm2456_vm5, %v1345_v24, %v1342_v19  ;;  %1834 = vpow2.f32 %v1254_v43  ;;  %v1251_v1 = vadd.f32 %v1247_v34, %v2224_v49  ;;  %v1261_v3 = vld [vmem:[%s2475_s29 + $0x20] sm:$0xff]  ;;  %v1080_v43 = vld [vmem:[%s2475_s29 + $0x30] sm:$0xff] }
 0x30b   : > { %v1063_v2 = vadd.f32 %v1043_v25, %v2700_v12  ;;  %v2701_v60 = vmax.f32 %v2325_v10, 0.0  ;;  %v1076_v27 = vmul.f32 1.442695, %v1069_v5  ;;  %1836 = vpow2.f32 %v1074_v7  ;;  %v2493_v4 = vpop.eup %1824  ;;  %v1078_v7 = vld [vmem:[%s2475_s29] sm:$0xff] }
 0x30c   : > { %v1070_v30 = vmul.f32 1.442695, %v1066_v21  ;;  %v1353_v26 = vadd.f32 1.0, %v1352_v52  ;;  %v1355_v41 = vand.u32 2147483647, %v2439_v11  ;;  %v1394_v51 = vadd.f32 1.0, %v1393_v48 }
 0x30d   : > { %v1360_v6 = vadd.f32 %v1348_v35, %v2701_v60  ;;  %v1067_v28 = vadd.f32 %v1063_v2, %v2253_v42  ;;  %v1258_v13 = vmul.f32 1.442695, %v1251_v1  ;;  %v1264_v49 = vmul.f32 %v2493_v4, %v1260_v20 }
 0x30e   : > { %1838 = vpow2.f32 %v1070_v30  ;;  %v1396_v10 = vand.u32 2147483647, %v2451_v0  ;;  %v1827_v40 = vpop.eup %1826  ;;  %v2702_v63 = vsub.s32 0, %v2069_v15  ;;  %v1305_v14 = vmax.f32 %v2347_v53, 0.0 }
 0x30f   : > { %v1364_v8 = vsub.f32 %v2162_v54, %v1360_v6  ;;  %v1072_v22 = vmul.f32 1.442695, %v1067_v28  ;;  %1840 = vpow2.f32 %v1076_v27  ;;  %v2507_v42 = vadd.f32 %v1264_v49, %v2312_v50 }
 0x310   : > { %v553_v36 = vrot.slane %v2077_v18, %v2702_v63  ;;  %1842 = vpow2.f32 %v1258_v13  ;;  %v1829_v59 = vpop.eup %1828  ;;  %v1351_v33 = vmul.f32 0.6931472, %v1827_v40  ;;  %v1354_v62 = vmul.f32 %v2439_v11, %v1353_v26  ;;  %v1262_v11 = vld [vmem:[%s2475_s29 + $0x38] sm:$0xff] }
 0x311   : > { %v2504_v37 = vsub.f32 %v1364_v8, %v2359_v39  ;;  %1844 = vpow2.f32 %v1072_v22  ;;  %v2511_v9 = vpop.eup %1830  ;;  %v1392_v38 = vmul.f32 0.6931472, %v1829_v59  ;;  %v1395_v29 = vmul.f32 %v2451_v0, %v1394_v51 }
 0x312   : > { %vm1356_vm6 = vcmp.lt.f32.partialorder %v1355_v41, 0.0004427343  ;;  %v1833_v50 = vpop.eup %1832  ;;  %v1370_v24 = vmax.f32 %v2377_v55, 0.0  ;;  %vm1397_vm7 = vcmp.lt.f32.partialorder %v1396_v10, 0.0004427343  ;;  %v1399_v53 = vadd.f32 1.0, %v2511_v9 }
 0x313   : > { %v1376_v34 = vand.u32 2147483647, %v2504_v37  ;;  %v1357_v61 = vsel %vm1356_vm6, %v1354_v62, %v1351_v33  ;;  %v1398_v56 = vsel %vm1397_vm7, %v1395_v29, %v1392_v38  ;;  %v801_v0 = vadd.f32 %v2083_v23, %v553_v36  ;;  %v1081_v41 = vld [vmem:[%s2475_s29 + $0x48] sm:$0xff]  ;;  %v1263_v10 = vld [vmem:[%s2475_s29 + $0x50] sm:$0xff] }
 0x314   : > { %v1361_v44 = vadd.f32 %v1357_v61, %v1305_v14  ;;  %v1835_v16 = vpop.eup %1834  ;;  %v568_v48 = vsub.s32 4, %v2069_v15  ;;  %v1426_v19 = vadd.f32 %v1398_v56, %v1370_v24  ;;  %1846 = vlog2.f32 %v1399_v53 }
 0x315   : > { %v1380_v52 = vsub.f32 0.0, %v1376_v34  ;;  %v2522_v21 = vpop.eup %1836  ;;  %v864_v55 = vadd.f32 %v2117_v46, %v2154_v47  ;;  %v1266_v35 = vmul.f32 %v1833_v50, %v1262_v11  ;;  %v858_v23 = vadd.f32 %v2099_v32, %v2154_v47  ;;  %v1079_v32 = vld [vmem:[%s2475_s29 + $0x18] sm:$0xff] }
 0x316   : > { %v1365_v5 = vsub.f32 %v2162_v54, %v1361_v44  ;;  %v1402_v15 = vmul.f32 -0.5, %v2511_v9  ;;  %v1430_v12 = vadd.f32 %v1426_v19, %v2359_v39  ;;  %v1265_v2 = vmul.f32 %v1835_v16, %v1261_v3  ;;  %v1442_v19 = vld [vmem:[%s2475_s29 + $0x10] sm:$0xff] }
 0x317   : > { %v1386_v25 = vmul.f32 1.442695, %v1380_v52  ;;  %v2535_v20 = vadd.f32 %v1266_v35, %v864_v55  ;;  %v1084_v54 = vmul.f32 %v2522_v21, %v1080_v43  ;;  %v805_v13 = vadd.f32 %v2097_v31, %v553_v36 }
 0x318   : > { %v1839_v1 = vpop.eup %1838  ;;  %v2533_v46 = vsub.f32 %v1365_v5, %v2359_v39  ;;  %v1434_v30 = vmul.f32 1.442695, %v1430_v12  ;;  %v2539_v26 = vadd.f32 %v1265_v2, %v858_v23  ;;  %v811_v51 = vadd.f32 %v2115_v45, %v553_v36 }
 0x319   : > { %1848 = vpow2.f32 %v1386_v25  ;;  %v1841_v60 = vpop.eup %1840  ;;  %v1090_v6 = vmul.f32 %v1839_v1, %v1839_v1  ;;  %v1082_v27 = vmul.f32 %v1839_v1, %v1078_v7  ;;  %v815_v8 = vadd.f32 %v2121_v57, %v553_v36 }
 0x31a   : > { %v2542_v28 = vpop.eup %1842  ;;  %v1377_v49 = vand.u32 2147483647, %v2533_v46  ;;  %v868_v40 = vadd.f32 %v2123_v58, %v2154_v47  ;;  %v1403_v63 = vadd.f32 1.0, %v1402_v15  ;;  %1850 = vpow2.f32 %v1434_v30  ;;  %v1443_v30 = vld [vmem:[%s2475_s29 + $0x28] sm:$0xff] }
 0x31b   : > { %v1845_v22 = vpop.eup %1844  ;;  %1094 = vadd.xlane.f32.xlu0 %v1090_v6  ;;  %v2551_v59 = vadd.f32 %v1082_v27, %v801_v0  ;;  %v1085_v31 = vmul.f32 %v1841_v60, %v1081_v41  ;;  %v1405_v45 = vand.u32 2147483647, %v2511_v9  ;;  %v1272_v57 = vmul.f32 %v2493_v4, %v2493_v4 }
 0x31c   : > { %v1381_v14 = vsub.f32 0.0, %v1377_v49  ;;  %v1091_v33 = vmul.f32 %v1845_v22, %v1845_v22  ;;  %v1083_v62 = vmul.f32 %v1845_v22, %v1079_v32  ;;  %v2556_v36 = vadd.f32 %v1084_v54, %v811_v51 }
 0x31d   : > { %v1267_v38 = vmul.f32 %v2542_v28, %v1263_v10  ;;  %v1274_v58 = vmul.f32 %v1833_v50, %v1833_v50  ;;  %v2561_v34 = vadd.f32 %v1085_v31, %v815_v8  ;;  %v1404_v11 = vmul.f32 %v2511_v9, %v1403_v63 }
 0x31e   : > { %v1388_v29 = vmul.f32 1.442695, %v1381_v14  ;;  %1096 = vadd.xlane.f32.xlu1 %v1091_v33  ;;  %v2559_v47 = vadd.f32 %v1083_v62, %v805_v13  ;;  %v1847_v24 = vpop.eup %1846  ;;  %v1371_v4 = vmax.f32 %v2432_v17, 0.0  ;;  %vm1406_vm8 = vcmp.lt.f32.partialorder %v1405_v45, 0.0004427343  ;;  %v2704_v13 = vld [vmem:[#allocation3_spill] sm:$0xff] }
 0x31f   : > { %1276 = vadd.xlane.f32.xlu0 %v1272_v57  ;;  %v2563_v53 = vadd.f32 %v1267_v38, %v868_v40  ;;  %v1401_v61 = vmul.f32 0.6931472, %v1847_v24  ;;  %v1273_v56 = vmul.f32 %v1835_v16, %v1835_v16  ;;  %v2568_v50 = vrot.slane %v2077_v18, %v568_v48  ;;  %v2703_v16 = vld [vmem:[#allocation2_spill] sm:$0xff] }
 0x320   : > { %1852 = vpow2.f32 %v1388_v29  ;;  %v1093_v43 = vmul.f32 %v1841_v60, %v1841_v60  ;;  %v1092_v9 = vmul.f32 %v2522_v21, %v2522_v21  ;;  %v1372_v6 = vmax.f32 %v2504_v37, 0.0 }
 0x321   : > { %v1407_v44 = vsel %vm1406_vm8, %v1404_v11, %v1401_v61  ;;  %v907_v25 = vadd.f32 %v2703_v16, %v2568_v50  ;;  %v911_v51 = vadd.f32 %v2704_v13, %v2568_v50  ;;  %v1373_v31 = vmax.f32 %v2533_v46, 0.0  ;;  %v2705_v61 = vld [vmem:[#allocation4_spill] sm:$0xff]  ;;  %v925_v16 = vld [vmem:[%s288_s9] sm:$0xff] }
 0x322   : > { %1280 = vadd.xlane.f32.xlu1 %v1274_v58  ;;  %v1427_v3 = vadd.f32 %v1407_v44, %v1371_v4  ;;  %v1444_v58 = vld [vmem:[%s2475_s29 + $0x40] sm:$0xff]  ;;  %v917_v11 = vadd.f32 %v2705_v61, %v2568_v50  ;;  %v1445_v44 = vld [vmem:[%s2475_s29 + $0x58] sm:$0xff] }
 0x323   : > { %v1849_v52 = vpop.eup %1848  ;;  %1278 = vadd.xlane.f32.xlu0 %v1273_v56 }
 0x324   : > { %v1408_v0 = vadd.f32 1.0, %v1849_v52  ;;  %v1851_v55 = vpop.eup %1850  ;;  %v1431_v17 = vadd.f32 %v1427_v3, %v2359_v39  ;;  %v1411_v7 = vmul.f32 -0.5, %v1849_v52  ;;  %v1414_v21 = vand.u32 2147483647, %v1849_v52 }
 0x325   : > { %v1454_v18 = vmul.f32 %v1851_v55, %v1851_v55  ;;  %v1446_v48 = vmul.f32 %v1851_v55, %v1442_v19 }
 0x326   : > { %1854 = vlog2.f32 %v1408_v0  ;;  %1100 = vadd.xlane.f32.xlu1 %v1093_v43  ;;  %v1436_v5 = vmul.f32 1.442695, %v1431_v17  ;;  %v1412_v12 = vadd.f32 1.0, %v1411_v7  ;;  %vm1415_vm9 = vcmp.lt.f32.partialorder %v1414_v21, 0.0004427343 }
 0x327   : > { %1098 = vadd.xlane.f32.xlu0 %v1092_v9  ;;  %v2576_v35 = vadd.f32 %v1446_v48, %v907_v25  ;;  %v2707_v9 = vlaneseq  ;;  %v1284_v7 = vadd.f32 %v2507_v42, %v925_v16 }
 0x328   : > { %1856 = vpow2.f32 %v1436_v5  ;;  %v1413_v54 = vmul.f32 %v1849_v52, %v1412_v12  ;;  %v1275_v52 = vmul.f32 %v2542_v28, %v2542_v28  ;;  %v1102_v28 = vadd.f32 %v2551_v59, %v925_v16 }
 0x329   : > { %v930_v17 = vand.u32 127, %v2707_v9 }
 0x32a   : > { %v1853_v23 = vpop.eup %1852  ;;  %1458 = vadd.xlane.f32.xlu1 %v1454_v18 }
 0x32b   : > { %v1417_v15 = vadd.f32 1.0, %v1853_v23  ;;  %v1420_v60 = vmul.f32 -0.5, %v1853_v23  ;;  %v1423_v22 = vand.u32 2147483647, %v1853_v23  ;;  %vm931_vm11 = vcmp.eq.s32.totalorder %v930_v17, 17 }
 0x32d   : > { %1858 = vlog2.f32 %v1417_v15  ;;  %v1421_v8 = vadd.f32 1.0, %v1420_v60  ;;  %vm1424_vm10 = vcmp.lt.f32.partialorder %v1423_v22, 0.0004427343 }
 0x32f   : > { %v1422_v62 = vmul.f32 %v1853_v23, %v1421_v8  ;;  %v927_v23 = vld [vmem:[%s288_s9 + $0x10] sm:$0xff] }
 0x330   : > { %v1855_v2 = vpop.eup %1854  ;;  %v1286_v59 = vadd.f32 %v2535_v20, %v927_v23 }
 0x331   : > { %v1410_v1 = vmul.f32 0.6931472, %v1855_v2 }
 0x332   : > { %v1857_v32 = vpop.eup %1856 }
 0x333   : > { %v1416_v27 = vsel %vm1415_vm9, %v1413_v54, %v1410_v1  ;;  %v1455_v49 = vmul.f32 %v1857_v32, %v1857_v32  ;;  %v1447_v10 = vmul.f32 %v1857_v32, %v1443_v30  ;;  %v928_v1 = vld [vmem:[%s288_s9 + $0x18] sm:$0xff] }
 0x334   : > { %v1428_v41 = vadd.f32 %v1416_v27, %v1372_v6  ;;  %v1105_v6 = vadd.f32 %v2561_v34, %v928_v1  ;;  %v1104_v27 = vadd.f32 %v2556_v36, %v927_v23 }
 0x335   : > { %1460 = vadd.xlane.f32.xlu1 %v1455_v49  ;;  %v2583_v63 = vadd.f32 %v1447_v10, %v911_v51 }
 0x336   : > { %v1432_v40 = vadd.f32 %v1428_v41, %v2359_v39  ;;  %v1466_v41 = vadd.f32 %v2576_v35, %v925_v16  ;;  %v1287_v35 = vadd.f32 %v2563_v53, %v928_v1 }
 0x337   : > { %v1859_v14 = vpop.eup %1858 }
 0x338   : > { %v1438_v37 = vmul.f32 1.442695, %v1432_v40  ;;  %v1419_v33 = vmul.f32 0.6931472, %v1859_v14 }
 0x33a   : > { %1860 = vpow2.f32 %v1438_v37  ;;  %v1425_v45 = vsel %vm1424_vm10, %v1422_v62, %v1419_v33 }
 0x33b   : > { %v1429_v57 = vadd.f32 %v1425_v45, %v1373_v31 }
 0x33d   : > { %v1433_v38 = vadd.f32 %v1429_v57, %v2359_v39  ;;  %v2706_v39 = vld [vmem:[#allocation5_spill] sm:$0xff] }
 0x33e   : > { %v921_v0 = vadd.f32 %v2706_v39, %v2568_v50  ;;  %v926_v50 = vld [vmem:[%s288_s9 + $0x8] sm:$0xff] }
 0x33f   : > { %v1440_v29 = vmul.f32 1.442695, %v1433_v38  ;;  %v1103_v48 = vadd.f32 %v2559_v47, %v926_v50  ;;  %v1285_v47 = vadd.f32 %v2539_v26, %v926_v50  ;;  %v1467_v34 = vadd.f32 %v2583_v63, %v926_v50 }
 0x341   : > { %1862 = vpow2.f32 %v1440_v29 }
 0x344   : > { %v1861_v24 = vpop.eup %1860 }
 0x345   : > { %v1456_v4 = vmul.f32 %v1861_v24, %v1861_v24  ;;  %v1448_v56 = vmul.f32 %v1861_v24, %v1444_v58 }
 0x347   : > { %1462 = vadd.xlane.f32.xlu0 %v1456_v4  ;;  %v1452_v46 = vadd.f32 %v1448_v56, %v917_v11 }
 0x349   : > { %v1468_v49 = vadd.f32 %v1452_v46, %v927_v23 }
 0x34b   : > { %1282 = vadd.xlane.f32.xlu0 %v1275_v52  ;;  %v1863_v3 = vpop.eup %1862 }
 0x34c   : > { %v1457_v19 = vmul.f32 %v1863_v3, %v1863_v3  ;;  %v1449_v43 = vmul.f32 %v1863_v3, %v1445_v44 }
 0x34e   : > { %1464 = vadd.xlane.f32.xlu1 %v1457_v19  ;;  %v1453_v55 = vadd.f32 %v1449_v43, %v921_v0 }
 0x350   : > { %v1469_v37 = vadd.f32 %v1453_v55, %v928_v1 }
 0x3a8   : > { %v1095_v25 = vpop.xlane.xlu0 %1094 }
 0x3a9   : > { %v1106_v18 = vsel %vm931_vm11, %v1095_v25, %v1102_v28 }
 0x3aa   : > { %1110 = vst [vmem:[%s2605_s12] sm:$0xff] %v1106_v18 }
 0x3ab   : > { %v1097_v5 = vpop.xlane.xlu1 %1096 }
 0x3ac   : > { %v1107_v15 = vsel %vm931_vm11, %v1097_v5, %v1103_v48  ;;  %v1277_v12 = vpop.xlane.xlu0 %1276 }
 0x3ad   : > { %1111 = vst [vmem:[%s2605_s12 + $0x18] sm:$0xff] %v1107_v15  ;;  %v1288_v21 = vsel %vm931_vm11, %v1277_v12, %v1284_v7 }
 0x3ae   : > { %1292 = vst [vmem:[%s2605_s12 + $0x8] sm:$0xff] %v1288_v21 }
 0x3af   : > { %v1281_v2 = vpop.xlane.xlu1 %1280 }
 0x3b0   : > { %v1290_v54 = vsel %vm931_vm11, %v1281_v2, %v1286_v59  ;;  %v1279_v42 = vpop.xlane.xlu0 %1278 }
 0x3b1   : > { %v1289_v60 = vsel %vm931_vm11, %v1279_v42, %v1285_v47  ;;  %1294 = vst [vmem:[%s2605_s12 + $0x38] sm:$0xff] %v1290_v54 }
 0x3b2   : > { %1293 = vst [vmem:[%s2605_s12 + $0x20] sm:$0xff] %v1289_v60 }
 0x3b3   : > { %v1101_v30 = vpop.xlane.xlu1 %1100 }
 0x3b4   : > { %v1109_v20 = vsel %vm931_vm11, %v1101_v30, %v1105_v6  ;;  %v1099_v32 = vpop.xlane.xlu0 %1098 }
 0x3b5   : > { %v1108_v26 = vsel %vm931_vm11, %v1099_v32, %v1104_v27  ;;  %1113 = vst [vmem:[%s2605_s12 + $0x48] sm:$0xff] %v1109_v20 }
 0x3b6   : > { %1112 = vst [vmem:[%s2605_s12 + $0x30] sm:$0xff] %v1108_v26 }
 0x3b7   : > { %v1459_v13 = vpop.xlane.xlu1 %1458 }
 0x3b8   : > { %v1470_v51 = vsel %vm931_vm11, %v1459_v13, %v1466_v41 }
 0x3b9   : > { %1474 = vst [vmem:[%s2605_s12 + $0x10] sm:$0xff] %v1470_v51 }
 0x3c2   : > { %v1461_v8 = vpop.xlane.xlu1 %1460 }
 0x3c3   : > { %v1471_v36 = vsel %vm931_vm11, %v1461_v8, %v1467_v34 }
 0x3c4   : > { %1475 = vst [vmem:[%s2605_s12 + $0x28] sm:$0xff] %v1471_v36 }
 0x3d4   : > { %v1463_v10 = vpop.xlane.xlu0 %1462 }
 0x3d5   : > { %v1472_v22 = vsel %vm931_vm11, %v1463_v10, %v1468_v49 }
 0x3d6   : > { %1476 = vst [vmem:[%s2605_s12 + $0x40] sm:$0xff] %v1472_v22 }
 0x3d8   : > { %v1283_v40 = vpop.xlane.xlu0 %1282 }
 0x3d9   : > { %v1291_v14 = vsel %vm931_vm11, %v1283_v40, %v1287_v35 }
 0x3da   : > { %1295 = vst [vmem:[%s2605_s12 + $0x50] sm:$0xff] %v1291_v14 }
 0x3db   : > { %v1465_v33 = vpop.xlane.xlu1 %1464 }
 0x3dc   : > { %v1473_v62 = vsel %vm931_vm11, %v1465_v33, %v1469_v37 }
 0x3dd   : > { %1477 = vst [vmem:[%s2605_s12 + $0x58] sm:$0xff] %v1473_v62 }
 0x3de PF: > { %s16_s21 = sadd.s32 1, %s1870_s21  }
 0x3df   : > { %p13_p4 = scmp.ge.s32.totalorder %s16_s21, 4  }
 0x3e1   :  { %15 = sbr.rel (!%p13_p4) target bundleno = 1 (0x1), region = 81 }

</bundles_post_ra>
